<compile_context>
chip_gen: v7x
topology: tpu7x:2x2x1
jax: 0.10.0
libtpu: 0.0.40
codegen_flags: <defaults>
</compile_context>

<pallas_src>
import jax
import jax.numpy as jnp
from jax.experimental import pallas as pl
from jax.experimental.pallas import tpu as pltpu


# ----------------------------- configuration -----------------------------
INPUT_SIZE = 4
HIDDEN_SIZE = 32          # 4*H = 128 -> lane-aligned gate groups
LSTM_LAYERS = 2
OUTPUT_SIZE = 4
BATCH = 2
SEQ_LEN = 8

# MXU operand dtype.  jnp.bfloat16 -> single-pass MXU on v6e/v7x (perf review
# item); float32 keeps exact parity with the f32 reference at 1e-3 tolerance.
MXU_DTYPE = jnp.float32


# ------------------------------- kernel ----------------------------------
def lstm2_linear_kernel(x_ref, hinit_ref, cinit_ref,
                        w_ih0_ref, b0_ref,
                        w_big_ref, b1_ref,
                        w_lin_ref, b_lin_ref,
                        y_ref, hn_ref, cn_ref):
    B, T, I = x_ref.shape
    H = hinit_ref.shape[2]
    G = 4 * H

    mxu_dt = w_big_ref.dtype   # matmul operand dtype chosen by the wrapper

    # ---- hoisted layer-0 input projection (+ b0) for ALL timesteps --------
    x_all = x_ref[...].astype(mxu_dt).reshape(B * T, I)
    xproj = (jnp.dot(x_all, w_ih0_ref[...],
                     preferred_element_type=jnp.float32)
             + b0_ref[...]).reshape(B, T, G)                  # (B, T, 4H)
    # Per-timestep gate inputs hoisted out of the recurrence (loop-invariant).
    xg = [xproj[:, t, :] for t in range(T)]                   # T x (B, 4H)

    # ---- resident weights / biases ----------------------------------------
    w_big = w_big_ref[...]                                     # (2H, 8H)
    w_lin = w_lin_ref[...]                                     # (H, O)
    b1 = jnp.broadcast_to(b1_ref[...].astype(jnp.float32), (B, G))
    b_lin = b_lin_ref[...].astype(jnp.float32)

    h0 = hinit_ref[0].astype(jnp.float32)                      # (B, H)
    c0 = cinit_ref[0].astype(jnp.float32)
    h1 = hinit_ref[1].astype(jnp.float32)
    c1 = cinit_ref[1].astype(jnp.float32)

    def cell(gates, c_prev):
        # Transcendentals on the full (B, 4H) register (EUP slot), then
        # static lane-group slices.  PyTorch gate order: (i, f, g, o).
        sig = jax.nn.sigmoid(gates)
        th = jnp.tanh(gates)
        i_g = sig[:, 0 * H:1 * H]
        f_g = sig[:, 1 * H:2 * H]
        g_g = th[:, 2 * H:3 * H]
        o_g = sig[:, 3 * H:4 * H]
        c_new = f_g * c_prev + i_g * g_g
        h_new = o_g * jnp.tanh(c_new)
        return h_new, c_new

    # ---- wavefront-skewed recurrence: T+1 fused matmuls (was 2T) ----------
    # At wavefront s: columns 0:4H of [h0_{s-1}, h1_{s-2}] @ W_big are the
    # h-contribution of layer-0 step s; columns 4H:8H are the full recurrent
    # gate input of layer-1 step s-1.
    h1_steps = []
    for s in range(T + 1):
        z = jnp.concatenate([h0, h1], axis=1).astype(mxu_dt)   # (B, 2H)
        g = jnp.dot(z, w_big, preferred_element_type=jnp.float32)  # (B, 8H)

        if s >= 1:                              # layer-1 step s-1
            h1, c1 = cell(g[:, G:] + b1, c1)
            h1_steps.append(h1)
        if s < T:                               # layer-0 step s
            h0, c0 = cell(g[:, :G] + xg[s], c0)

    # ---- single Linear head over all timesteps (register slab, no scratch) -
    hs = jnp.concatenate(h1_steps, axis=0).astype(mxu_dt)      # (T*B, H) time-major
    y = jnp.dot(hs, w_lin, preferred_element_type=jnp.float32) + b_lin
    y_ref[...] = y.astype(y_ref.dtype)                         # (T*B, O)

    hn_ref[0] = h0.astype(hn_ref.dtype)
    hn_ref[1] = h1.astype(hn_ref.dtype)
    cn_ref[0] = c0.astype(cn_ref.dtype)
    cn_ref[1] = c1.astype(cn_ref.dtype)


# ------------------------------- wrapper ----------------------------------
def net_forward(x, params, hidden=None):
    """x: (B, T, I) float32 (PyTorch batch_first layout).
    Returns (linear_out (B, T, O), (h_n (L, B, H), c_n (L, B, H)))."""
    B, T, I = x.shape
    H = HIDDEN_SIZE
    L = LSTM_LAYERS
    O = OUTPUT_SIZE

    (w_ih0, w_hh0, b0), (w_ih1, w_hh1, b1) = params["lstm"]
    w_lin, b_lin = params["linear"]

    # Fused wavefront weight: [[w_hh0, w_ih1], [0, w_hh1]] -> (2H, 8H).
    w_big = jnp.concatenate(
        [jnp.concatenate([w_hh0, w_ih1], axis=1),
         jnp.concatenate([jnp.zeros_like(w_hh1), w_hh1], axis=1)],
        axis=0)

    if hidden is None:
        h_init = jnp.zeros((L, B, H), jnp.float32)
        c_init = jnp.zeros((L, B, H), jnp.float32)
    else:
        h_init, c_init = hidden

    # MXU operand precision is decided here (weights cast once, outside kernel).
    w_ih0_m = w_ih0.astype(MXU_DTYPE)
    w_big_m = w_big.astype(MXU_DTYPE)
    w_lin_m = w_lin.astype(MXU_DTYPE)

    vmem = pl.BlockSpec(memory_space=pltpu.MemorySpace.VMEM)

    y_flat, h_n, c_n = pl.pallas_call(
        lstm2_linear_kernel,
        out_shape=(
            jax.ShapeDtypeStruct((T * B, O), jnp.float32),
            jax.ShapeDtypeStruct((L, B, H), jnp.float32),
            jax.ShapeDtypeStruct((L, B, H), jnp.float32),
        ),
        in_specs=[vmem] * 9,
        out_specs=(vmem, vmem, vmem),
    )(x, h_init, c_init, w_ih0_m, b0, w_big_m, b1, w_lin_m, b_lin)

    # Kernel emits a time-major (T*B, O) slab; restore batch_first (B, T, O).
    y = jnp.transpose(y_flat.reshape(T, B, O), (1, 0, 2))
    return y, (h_n, c_n)


# ------------------------- parameter initialization ------------------------
def init_params(key):
    """PyTorch-style LSTM/Linear params. Gate order (i, f, g, o).
    Weights are stored transposed (in_features, out_features) so the kernel
    multiplies as x @ W.  b_ih and b_hh are pre-summed into a single bias."""
    H = HIDDEN_SIZE
    bound = 1.0 / jnp.sqrt(jnp.float32(H))
    keys = jax.random.split(key, 16)
    k = iter(keys)
    u = lambda shape: jax.random.uniform(next(k), shape, jnp.float32,
                                         minval=-bound, maxval=bound)

    lstm = []
    for layer in range(LSTM_LAYERS):
        in_dim = INPUT_SIZE if layer == 0 else H
        w_ih = u((in_dim, 4 * H))              # transposed weight_ih_l{k}
        w_hh = u((H, 4 * H))                   # transposed weight_hh_l{k}
        bias = u((1, 4 * H)) + u((1, 4 * H))   # b_ih + b_hh
        lstm.append((w_ih, w_hh, bias))

    w_lin = u((H, OUTPUT_SIZE))                # transposed Linear weight
    b_lin = u((1, OUTPUT_SIZE))
    return {"lstm": tuple(lstm), "linear": (w_lin, b_lin)}


# --------------------------- pure-JAX reference ----------------------------
def reference_forward(x_btI, params):
    B = x_btI.shape[0]
    H = HIDDEN_SIZE
    layer_in = x_btI
    h_ns, c_ns = [], []
    for (w_ih, w_hh, b) in params["lstm"]:
        def step(carry, x_t):
            h, c = carry
            gates = x_t @ w_ih + h @ w_hh + b
            i = jax.nn.sigmoid(gates[:, 0 * H:1 * H])
            f = jax.nn.sigmoid(gates[:, 1 * H:2 * H])
            g = jnp.tanh(gates[:, 2 * H:3 * H])
            o = jax.nn.sigmoid(gates[:, 3 * H:4 * H])
            c = f * c + i * g
            h = o * jnp.tanh(c)
            return (h, c), h
        init = (jnp.zeros((B, H), jnp.float32), jnp.zeros((B, H), jnp.float32))
        (h_n, c_n), hs = jax.lax.scan(step, init,
                                      jnp.transpose(layer_in, (1, 0, 2)))
        layer_in = jnp.transpose(hs, (1, 0, 2))
        h_ns.append(h_n)
        c_ns.append(c_n)
    w_lin, b_lin = params["linear"]
    return layer_in @ w_lin + b_lin, (jnp.stack(h_ns), jnp.stack(c_ns))


# --------------------------------- main ------------------------------------
if __name__ == "__main__":
    key = jax.random.PRNGKey(0)
    k_x, k_p = jax.random.split(key)
    x = jax.random.normal(k_x, (BATCH, SEQ_LEN, INPUT_SIZE), jnp.float32)
    params = init_params(k_p)

    fwd = jax.jit(net_forward)
    out, (h_n, c_n) = fwd(x, params)
    jax.block_until_ready((out, h_n, c_n))

    ref_out, (ref_h, ref_c) = reference_forward(x, params)
    assert out.shape == (BATCH, SEQ_LEN, OUTPUT_SIZE)
    assert h_n.shape == (LSTM_LAYERS, BATCH, HIDDEN_SIZE)
    assert c_n.shape == (LSTM_LAYERS, BATCH, HIDDEN_SIZE)
    assert jnp.allclose(out, ref_out, atol=1e-3, rtol=1e-3)
    assert jnp.allclose(h_n, ref_h, atol=1e-3, rtol=1e-3)
    assert jnp.allclose(c_n, ref_c, atol=1e-3, rtol=1e-3)

    print("KERNEL_OK")
</pallas_src>

<mosaic_0001>
module attributes {stable_mosaic.version = 11 : i64} {
  func.func @lstm2_linear_kernel(%arg0: memref<2x8x4xf32, #tpu.memory_space<vmem>>, %arg1: memref<2x2x32xf32, #tpu.memory_space<vmem>>, %arg2: memref<2x2x32xf32, #tpu.memory_space<vmem>>, %arg3: memref<4x128xf32, #tpu.memory_space<vmem>>, %arg4: memref<1x128xf32, #tpu.memory_space<vmem>>, %arg5: memref<64x256xf32, #tpu.memory_space<vmem>>, %arg6: memref<1x128xf32, #tpu.memory_space<vmem>>, %arg7: memref<32x4xf32, #tpu.memory_space<vmem>>, %arg8: memref<1x4xf32, #tpu.memory_space<vmem>>, %arg9: memref<16x4xf32, #tpu.memory_space<vmem>>, %arg10: memref<2x2x32xf32, #tpu.memory_space<vmem>>, %arg11: memref<2x2x32xf32, #tpu.memory_space<vmem>>) attributes {dimension_semantics = [], scalar_prefetch = 0 : i64, scratch_operands = 0 : i64, tpu.core_type = #tpu.core_type<tc>} {
    %c0 = arith.constant 0 : index
    %c0_0 = arith.constant 0 : index
    %c0_1 = arith.constant 0 : index
    %0 = vector.load %arg0[%c0, %c0_0, %c0_1] : memref<2x8x4xf32, #tpu.memory_space<vmem>>, vector<2x8x4xf32>
    %1 = vector.shape_cast %0 : vector<2x8x4xf32> to vector<16x4xf32>
    %c0_2 = arith.constant 0 : index
    %c0_3 = arith.constant 0 : index
    %2 = vector.load %arg3[%c0_2, %c0_3] : memref<4x128xf32, #tpu.memory_space<vmem>>, vector<4x128xf32>
    %cst = arith.constant dense<0.000000e+00> : vector<16x128xf32>
    %3 = tpu.matmul %1, %2, %cst {dimension_numbers = #tpu.dot_dimension_numbers<[1], [0], [0], [1], [0, 0, 1, 1], [], []>} : vector<16x4xf32>, vector<4x128xf32>, vector<16x128xf32> -> vector<16x128xf32>
    %c0_4 = arith.constant 0 : index
    %c0_5 = arith.constant 0 : index
    %4 = vector.load %arg4[%c0_4, %c0_5] : memref<1x128xf32, #tpu.memory_space<vmem>>, vector<1x128xf32>
    %5 = vector.broadcast %4 : vector<1x128xf32> to vector<16x128xf32>
    %6 = arith.addf %3, %5 : vector<16x128xf32>
    %7 = vector.shape_cast %6 : vector<16x128xf32> to vector<2x8x128xf32>
    %8 = vector.extract_strided_slice %7 {offsets = [0, 0, 0], sizes = [2, 1, 128], strides = [1, 1, 1]} : vector<2x8x128xf32> to vector<2x1x128xf32>
    %9 = vector.shape_cast %8 : vector<2x1x128xf32> to vector<2x128xf32>
    %10 = vector.extract_strided_slice %7 {offsets = [0, 1, 0], sizes = [2, 1, 128], strides = [1, 1, 1]} : vector<2x8x128xf32> to vector<2x1x128xf32>
    %11 = vector.shape_cast %10 : vector<2x1x128xf32> to vector<2x128xf32>
    %12 = vector.extract_strided_slice %7 {offsets = [0, 2, 0], sizes = [2, 1, 128], strides = [1, 1, 1]} : vector<2x8x128xf32> to vector<2x1x128xf32>
    %13 = vector.shape_cast %12 : vector<2x1x128xf32> to vector<2x128xf32>
    %14 = vector.extract_strided_slice %7 {offsets = [0, 3, 0], sizes = [2, 1, 128], strides = [1, 1, 1]} : vector<2x8x128xf32> to vector<2x1x128xf32>
    %15 = vector.shape_cast %14 : vector<2x1x128xf32> to vector<2x128xf32>
    %16 = vector.extract_strided_slice %7 {offsets = [0, 4, 0], sizes = [2, 1, 128], strides = [1, 1, 1]} : vector<2x8x128xf32> to vector<2x1x128xf32>
    %17 = vector.shape_cast %16 : vector<2x1x128xf32> to vector<2x128xf32>
    %18 = vector.extract_strided_slice %7 {offsets = [0, 5, 0], sizes = [2, 1, 128], strides = [1, 1, 1]} : vector<2x8x128xf32> to vector<2x1x128xf32>
    %19 = vector.shape_cast %18 : vector<2x1x128xf32> to vector<2x128xf32>
    %20 = vector.extract_strided_slice %7 {offsets = [0, 6, 0], sizes = [2, 1, 128], strides = [1, 1, 1]} : vector<2x8x128xf32> to vector<2x1x128xf32>
    %21 = vector.shape_cast %20 : vector<2x1x128xf32> to vector<2x128xf32>
    %22 = vector.extract_strided_slice %7 {offsets = [0, 7, 0], sizes = [2, 1, 128], strides = [1, 1, 1]} : vector<2x8x128xf32> to vector<2x1x128xf32>
    %23 = vector.shape_cast %22 : vector<2x1x128xf32> to vector<2x128xf32>
    %c0_6 = arith.constant 0 : index
    %c0_7 = arith.constant 0 : index
    %24 = vector.load %arg5[%c0_6, %c0_7] : memref<64x256xf32, #tpu.memory_space<vmem>>, vector<64x256xf32>
    %c0_8 = arith.constant 0 : index
    %c0_9 = arith.constant 0 : index
    %25 = vector.load %arg7[%c0_8, %c0_9] : memref<32x4xf32, #tpu.memory_space<vmem>>, vector<32x4xf32>
    %c0_10 = arith.constant 0 : index
    %c0_11 = arith.constant 0 : index
    %26 = vector.load %arg6[%c0_10, %c0_11] : memref<1x128xf32, #tpu.memory_space<vmem>>, vector<1x128xf32>
    %27 = vector.shape_cast %26 : vector<1x128xf32> to vector<1x128xf32>
    %28 = vector.broadcast %27 : vector<1x128xf32> to vector<2x128xf32>
    %c0_12 = arith.constant 0 : index
    %c0_13 = arith.constant 0 : index
    %29 = vector.load %arg8[%c0_12, %c0_13] : memref<1x4xf32, #tpu.memory_space<vmem>>, vector<1x4xf32>
    %c0_14 = arith.constant 0 : index
    %c0_15 = arith.constant 0 : index
    %c0_16 = arith.constant 0 : index
    %30 = vector.load %arg1[%c0_14, %c0_15, %c0_16] : memref<2x2x32xf32, #tpu.memory_space<vmem>>, vector<1x2x32xf32>
    %31 = vector.shape_cast %30 : vector<1x2x32xf32> to vector<2x32xf32>
    %c0_17 = arith.constant 0 : index
    %c0_18 = arith.constant 0 : index
    %c0_19 = arith.constant 0 : index
    %32 = vector.load %arg2[%c0_17, %c0_18, %c0_19] : memref<2x2x32xf32, #tpu.memory_space<vmem>>, vector<1x2x32xf32>
    %33 = vector.shape_cast %32 : vector<1x2x32xf32> to vector<2x32xf32>
    %c1 = arith.constant 1 : index
    %c0_20 = arith.constant 0 : index
    %c0_21 = arith.constant 0 : index
    %34 = vector.load %arg1[%c1, %c0_20, %c0_21] : memref<2x2x32xf32, #tpu.memory_space<vmem>>, vector<1x2x32xf32>
    %35 = vector.shape_cast %34 : vector<1x2x32xf32> to vector<2x32xf32>
    %c1_22 = arith.constant 1 : index
    %c0_23 = arith.constant 0 : index
    %c0_24 = arith.constant 0 : index
    %36 = vector.load %arg2[%c1_22, %c0_23, %c0_24] : memref<2x2x32xf32, #tpu.memory_space<vmem>>, vector<1x2x32xf32>
    %37 = vector.shape_cast %36 : vector<1x2x32xf32> to vector<2x32xf32>
    %38 = tpu.concatenate %31, %35 in 1 : vector<2x32xf32>, vector<2x32xf32> -> vector<2x64xf32>
    %cst_25 = arith.constant dense<0.000000e+00> : vector<2x256xf32>
    %39 = tpu.matmul %38, %24, %cst_25 {dimension_numbers = #tpu.dot_dimension_numbers<[1], [0], [0], [1], [0, 0, 1, 1], [], []>} : vector<2x64xf32>, vector<64x256xf32>, vector<2x256xf32> -> vector<2x256xf32>
    %40 = vector.extract_strided_slice %39 {offsets = [0, 0], sizes = [2, 128], strides = [1, 1]} : vector<2x256xf32> to vector<2x128xf32>
    %41 = arith.addf %40, %9 : vector<2x128xf32>
    %42 = arith.negf %41 : vector<2x128xf32>
    %43 = math.exp %42 : vector<2x128xf32>
    %cst_26 = arith.constant 1.000000e+00 : f32
    %44 = vector.broadcast %cst_26 : f32 to vector<2x128xf32>
    %45 = arith.addf %44, %43 : vector<2x128xf32>
    %46 = arith.divf %44, %45 : vector<2x128xf32>
    %47 = math.tanh %41 : vector<2x128xf32>
    %48 = vector.extract_strided_slice %46 {offsets = [0, 0], sizes = [2, 32], strides = [1, 1]} : vector<2x128xf32> to vector<2x32xf32>
    %49 = vector.extract_strided_slice %46 {offsets = [0, 32], sizes = [2, 32], strides = [1, 1]} : vector<2x128xf32> to vector<2x32xf32>
    %50 = vector.extract_strided_slice %47 {offsets = [0, 64], sizes = [2, 32], strides = [1, 1]} : vector<2x128xf32> to vector<2x32xf32>
    %51 = vector.extract_strided_slice %46 {offsets = [0, 96], sizes = [2, 32], strides = [1, 1]} : vector<2x128xf32> to vector<2x32xf32>
    %52 = arith.mulf %49, %33 : vector<2x32xf32>
    %53 = arith.mulf %48, %50 : vector<2x32xf32>
    %54 = arith.addf %52, %53 : vector<2x32xf32>
    %55 = math.tanh %54 : vector<2x32xf32>
    %56 = arith.mulf %51, %55 : vector<2x32xf32>
    %57 = tpu.concatenate %56, %35 in 1 : vector<2x32xf32>, vector<2x32xf32> -> vector<2x64xf32>
    %cst_27 = arith.constant dense<0.000000e+00> : vector<2x256xf32>
    %58 = tpu.matmul %57, %24, %cst_27 {dimension_numbers = #tpu.dot_dimension_numbers<[1], [0], [0], [1], [0, 0, 1, 1], [], []>} : vector<2x64xf32>, vector<64x256xf32>, vector<2x256xf32> -> vector<2x256xf32>
    %59 = vector.extract_strided_slice %58 {offsets = [0, 128], sizes = [2, 128], strides = [1, 1]} : vector<2x256xf32> to vector<2x128xf32>
    %60 = arith.addf %59, %28 : vector<2x128xf32>
    %61 = arith.negf %60 : vector<2x128xf32>
    %62 = math.exp %61 : vector<2x128xf32>
    %cst_28 = arith.constant 1.000000e+00 : f32
    %63 = vector.broadcast %cst_28 : f32 to vector<2x128xf32>
    %64 = arith.addf %63, %62 : vector<2x128xf32>
    %65 = arith.divf %63, %64 : vector<2x128xf32>
    %66 = math.tanh %60 : vector<2x128xf32>
    %67 = vector.extract_strided_slice %65 {offsets = [0, 0], sizes = [2, 32], strides = [1, 1]} : vector<2x128xf32> to vector<2x32xf32>
    %68 = vector.extract_strided_slice %65 {offsets = [0, 32], sizes = [2, 32], strides = [1, 1]} : vector<2x128xf32> to vector<2x32xf32>
    %69 = vector.extract_strided_slice %66 {offsets = [0, 64], sizes = [2, 32], strides = [1, 1]} : vector<2x128xf32> to vector<2x32xf32>
    %70 = vector.extract_strided_slice %65 {offsets = [0, 96], sizes = [2, 32], strides = [1, 1]} : vector<2x128xf32> to vector<2x32xf32>
    %71 = arith.mulf %68, %37 : vector<2x32xf32>
    %72 = arith.mulf %67, %69 : vector<2x32xf32>
    %73 = arith.addf %71, %72 : vector<2x32xf32>
    %74 = math.tanh %73 : vector<2x32xf32>
    %75 = arith.mulf %70, %74 : vector<2x32xf32>
    %76 = vector.extract_strided_slice %58 {offsets = [0, 0], sizes = [2, 128], strides = [1, 1]} : vector<2x256xf32> to vector<2x128xf32>
    %77 = arith.addf %76, %11 : vector<2x128xf32>
    %78 = arith.negf %77 : vector<2x128xf32>
    %79 = math.exp %78 : vector<2x128xf32>
    %cst_29 = arith.constant 1.000000e+00 : f32
    %80 = vector.broadcast %cst_29 : f32 to vector<2x128xf32>
    %81 = arith.addf %80, %79 : vector<2x128xf32>
    %82 = arith.divf %80, %81 : vector<2x128xf32>
    %83 = math.tanh %77 : vector<2x128xf32>
    %84 = vector.extract_strided_slice %82 {offsets = [0, 0], sizes = [2, 32], strides = [1, 1]} : vector<2x128xf32> to vector<2x32xf32>
    %85 = vector.extract_strided_slice %82 {offsets = [0, 32], sizes = [2, 32], strides = [1, 1]} : vector<2x128xf32> to vector<2x32xf32>
    %86 = vector.extract_strided_slice %83 {offsets = [0, 64], sizes = [2, 32], strides = [1, 1]} : vector<2x128xf32> to vector<2x32xf32>
    %87 = vector.extract_strided_slice %82 {offsets = [0, 96], sizes = [2, 32], strides = [1, 1]} : vector<2x128xf32> to vector<2x32xf32>
    %88 = arith.mulf %85, %54 : vector<2x32xf32>
    %89 = arith.mulf %84, %86 : vector<2x32xf32>
    %90 = arith.addf %88, %89 : vector<2x32xf32>
    %91 = math.tanh %90 : vector<2x32xf32>
    %92 = arith.mulf %87, %91 : vector<2x32xf32>
    %93 = tpu.concatenate %92, %75 in 1 : vector<2x32xf32>, vector<2x32xf32> -> vector<2x64xf32>
    %cst_30 = arith.constant dense<0.000000e+00> : vector<2x256xf32>
    %94 = tpu.matmul %93, %24, %cst_30 {dimension_numbers = #tpu.dot_dimension_numbers<[1], [0], [0], [1], [0, 0, 1, 1], [], []>} : vector<2x64xf32>, vector<64x256xf32>, vector<2x256xf32> -> vector<2x256xf32>
    %95 = vector.extract_strided_slice %94 {offsets = [0, 128], sizes = [2, 128], strides = [1, 1]} : vector<2x256xf32> to vector<2x128xf32>
    %96 = arith.addf %95, %28 : vector<2x128xf32>
    %97 = arith.negf %96 : vector<2x128xf32>
    %98 = math.exp %97 : vector<2x128xf32>
    %cst_31 = arith.constant 1.000000e+00 : f32
    %99 = vector.broadcast %cst_31 : f32 to vector<2x128xf32>
    %100 = arith.addf %99, %98 : vector<2x128xf32>
    %101 = arith.divf %99, %100 : vector<2x128xf32>
    %102 = math.tanh %96 : vector<2x128xf32>
    %103 = vector.extract_strided_slice %101 {offsets = [0, 0], sizes = [2, 32], strides = [1, 1]} : vector<2x128xf32> to vector<2x32xf32>
    %104 = vector.extract_strided_slice %101 {offsets = [0, 32], sizes = [2, 32], strides = [1, 1]} : vector<2x128xf32> to vector<2x32xf32>
    %105 = vector.extract_strided_slice %102 {offsets = [0, 64], sizes = [2, 32], strides = [1, 1]} : vector<2x128xf32> to vector<2x32xf32>
    %106 = vector.extract_strided_slice %101 {offsets = [0, 96], sizes = [2, 32], strides = [1, 1]} : vector<2x128xf32> to vector<2x32xf32>
    %107 = arith.mulf %104, %73 : vector<2x32xf32>
    %108 = arith.mulf %103, %105 : vector<2x32xf32>
    %109 = arith.addf %107, %108 : vector<2x32xf32>
    %110 = math.tanh %109 : vector<2x32xf32>
    %111 = arith.mulf %106, %110 : vector<2x32xf32>
    %112 = vector.extract_strided_slice %94 {offsets = [0, 0], sizes = [2, 128], strides = [1, 1]} : vector<2x256xf32> to vector<2x128xf32>
    %113 = arith.addf %112, %13 : vector<2x128xf32>
    %114 = arith.negf %113 : vector<2x128xf32>
    %115 = math.exp %114 : vector<2x128xf32>
    %cst_32 = arith.constant 1.000000e+00 : f32
    %116 = vector.broadcast %cst_32 : f32 to vector<2x128xf32>
    %117 = arith.addf %116, %115 : vector<2x128xf32>
    %118 = arith.divf %116, %117 : vector<2x128xf32>
    %119 = math.tanh %113 : vector<2x128xf32>
    %120 = vector.extract_strided_slice %118 {offsets = [0, 0], sizes = [2, 32], strides = [1, 1]} : vector<2x128xf32> to vector<2x32xf32>
    %121 = vector.extract_strided_slice %118 {offsets = [0, 32], sizes = [2, 32], strides = [1, 1]} : vector<2x128xf32> to vector<2x32xf32>
    %122 = vector.extract_strided_slice %119 {offsets = [0, 64], sizes = [2, 32], strides = [1, 1]} : vector<2x128xf32> to vector<2x32xf32>
    %123 = vector.extract_strided_slice %118 {offsets = [0, 96], sizes = [2, 32], strides = [1, 1]} : vector<2x128xf32> to vector<2x32xf32>
    %124 = arith.mulf %121, %90 : vector<2x32xf32>
    %125 = arith.mulf %120, %122 : vector<2x32xf32>
    %126 = arith.addf %124, %125 : vector<2x32xf32>
    %127 = math.tanh %126 : vector<2x32xf32>
    %128 = arith.mulf %123, %127 : vector<2x32xf32>
    %129 = tpu.concatenate %128, %111 in 1 : vector<2x32xf32>, vector<2x32xf32> -> vector<2x64xf32>
    %cst_33 = arith.constant dense<0.000000e+00> : vector<2x256xf32>
    %130 = tpu.matmul %129, %24, %cst_33 {dimension_numbers = #tpu.dot_dimension_numbers<[1], [0], [0], [1], [0, 0, 1, 1], [], []>} : vector<2x64xf32>, vector<64x256xf32>, vector<2x256xf32> -> vector<2x256xf32>
    %131 = vector.extract_strided_slice %130 {offsets = [0, 128], sizes = [2, 128], strides = [1, 1]} : vector<2x256xf32> to vector<2x128xf32>
    %132 = arith.addf %131, %28 : vector<2x128xf32>
    %133 = arith.negf %132 : vector<2x128xf32>
    %134 = math.exp %133 : vector<2x128xf32>
    %cst_34 = arith.constant 1.000000e+00 : f32
    %135 = vector.broadcast %cst_34 : f32 to vector<2x128xf32>
    %136 = arith.addf %135, %134 : vector<2x128xf32>
    %137 = arith.divf %135, %136 : vector<2x128xf32>
    %138 = math.tanh %132 : vector<2x128xf32>
    %139 = vector.extract_strided_slice %137 {offsets = [0, 0], sizes = [2, 32], strides = [1, 1]} : vector<2x128xf32> to vector<2x32xf32>
    %140 = vector.extract_strided_slice %137 {offsets = [0, 32], sizes = [2, 32], strides = [1, 1]} : vector<2x128xf32> to vector<2x32xf32>
    %141 = vector.extract_strided_slice %138 {offsets = [0, 64], sizes = [2, 32], strides = [1, 1]} : vector<2x128xf32> to vector<2x32xf32>
    %142 = vector.extract_strided_slice %137 {offsets = [0, 96], sizes = [2, 32], strides = [1, 1]} : vector<2x128xf32> to vector<2x32xf32>
    %143 = arith.mulf %140, %109 : vector<2x32xf32>
    %144 = arith.mulf %139, %141 : vector<2x32xf32>
    %145 = arith.addf %143, %144 : vector<2x32xf32>
    %146 = math.tanh %145 : vector<2x32xf32>
    %147 = arith.mulf %142, %146 : vector<2x32xf32>
    %148 = vector.extract_strided_slice %130 {offsets = [0, 0], sizes = [2, 128], strides = [1, 1]} : vector<2x256xf32> to vector<2x128xf32>
    %149 = arith.addf %148, %15 : vector<2x128xf32>
    %150 = arith.negf %149 : vector<2x128xf32>
    %151 = math.exp %150 : vector<2x128xf32>
    %cst_35 = arith.constant 1.000000e+00 : f32
    %152 = vector.broadcast %cst_35 : f32 to vector<2x128xf32>
    %153 = arith.addf %152, %151 : vector<2x128xf32>
    %154 = arith.divf %152, %153 : vector<2x128xf32>
    %155 = math.tanh %149 : vector<2x128xf32>
    %156 = vector.extract_strided_slice %154 {offsets = [0, 0], sizes = [2, 32], strides = [1, 1]} : vector<2x128xf32> to vector<2x32xf32>
    %157 = vector.extract_strided_slice %154 {offsets = [0, 32], sizes = [2, 32], strides = [1, 1]} : vector<2x128xf32> to vector<2x32xf32>
    %158 = vector.extract_strided_slice %155 {offsets = [0, 64], sizes = [2, 32], strides = [1, 1]} : vector<2x128xf32> to vector<2x32xf32>
    %159 = vector.extract_strided_slice %154 {offsets = [0, 96], sizes = [2, 32], strides = [1, 1]} : vector<2x128xf32> to vector<2x32xf32>
    %160 = arith.mulf %157, %126 : vector<2x32xf32>
    %161 = arith.mulf %156, %158 : vector<2x32xf32>
    %162 = arith.addf %160, %161 : vector<2x32xf32>
    %163 = math.tanh %162 : vector<2x32xf32>
    %164 = arith.mulf %159, %163 : vector<2x32xf32>
    %165 = tpu.concatenate %164, %147 in 1 : vector<2x32xf32>, vector<2x32xf32> -> vector<2x64xf32>
    %cst_36 = arith.constant dense<0.000000e+00> : vector<2x256xf32>
    %166 = tpu.matmul %165, %24, %cst_36 {dimension_numbers = #tpu.dot_dimension_numbers<[1], [0], [0], [1], [0, 0, 1, 1], [], []>} : vector<2x64xf32>, vector<64x256xf32>, vector<2x256xf32> -> vector<2x256xf32>
    %167 = vector.extract_strided_slice %166 {offsets = [0, 128], sizes = [2, 128], strides = [1, 1]} : vector<2x256xf32> to vector<2x128xf32>
    %168 = arith.addf %167, %28 : vector<2x128xf32>
    %169 = arith.negf %168 : vector<2x128xf32>
    %170 = math.exp %169 : vector<2x128xf32>
    %cst_37 = arith.constant 1.000000e+00 : f32
    %171 = vector.broadcast %cst_37 : f32 to vector<2x128xf32>
    %172 = arith.addf %171, %170 : vector<2x128xf32>
    %173 = arith.divf %171, %172 : vector<2x128xf32>
    %174 = math.tanh %168 : vector<2x128xf32>
    %175 = vector.extract_strided_slice %173 {offsets = [0, 0], sizes = [2, 32], strides = [1, 1]} : vector<2x128xf32> to vector<2x32xf32>
    %176 = vector.extract_strided_slice %173 {offsets = [0, 32], sizes = [2, 32], strides = [1, 1]} : vector<2x128xf32> to vector<2x32xf32>
    %177 = vector.extract_strided_slice %174 {offsets = [0, 64], sizes = [2, 32], strides = [1, 1]} : vector<2x128xf32> to vector<2x32xf32>
    %178 = vector.extract_strided_slice %173 {offsets = [0, 96], sizes = [2, 32], strides = [1, 1]} : vector<2x128xf32> to vector<2x32xf32>
    %179 = arith.mulf %176, %145 : vector<2x32xf32>
    %180 = arith.mulf %175, %177 : vector<2x32xf32>
    %181 = arith.addf %179, %180 : vector<2x32xf32>
    %182 = math.tanh %181 : vector<2x32xf32>
    %183 = arith.mulf %178, %182 : vector<2x32xf32>
    %184 = vector.extract_strided_slice %166 {offsets = [0, 0], sizes = [2, 128], strides = [1, 1]} : vector<2x256xf32> to vector<2x128xf32>
    %185 = arith.addf %184, %17 : vector<2x128xf32>
    %186 = arith.negf %185 : vector<2x128xf32>
    %187 = math.exp %186 : vector<2x128xf32>
    %cst_38 = arith.constant 1.000000e+00 : f32
    %188 = vector.broadcast %cst_38 : f32 to vector<2x128xf32>
    %189 = arith.addf %188, %187 : vector<2x128xf32>
    %190 = arith.divf %188, %189 : vector<2x128xf32>
    %191 = math.tanh %185 : vector<2x128xf32>
    %192 = vector.extract_strided_slice %190 {offsets = [0, 0], sizes = [2, 32], strides = [1, 1]} : vector<2x128xf32> to vector<2x32xf32>
    %193 = vector.extract_strided_slice %190 {offsets = [0, 32], sizes = [2, 32], strides = [1, 1]} : vector<2x128xf32> to vector<2x32xf32>
    %194 = vector.extract_strided_slice %191 {offsets = [0, 64], sizes = [2, 32], strides = [1, 1]} : vector<2x128xf32> to vector<2x32xf32>
    %195 = vector.extract_strided_slice %190 {offsets = [0, 96], sizes = [2, 32], strides = [1, 1]} : vector<2x128xf32> to vector<2x32xf32>
    %196 = arith.mulf %193, %162 : vector<2x32xf32>
    %197 = arith.mulf %192, %194 : vector<2x32xf32>
    %198 = arith.addf %196, %197 : vector<2x32xf32>
    %199 = math.tanh %198 : vector<2x32xf32>
    %200 = arith.mulf %195, %199 : vector<2x32xf32>
    %201 = tpu.concatenate %200, %183 in 1 : vector<2x32xf32>, vector<2x32xf32> -> vector<2x64xf32>
    %cst_39 = arith.constant dense<0.000000e+00> : vector<2x256xf32>
    %202 = tpu.matmul %201, %24, %cst_39 {dimension_numbers = #tpu.dot_dimension_numbers<[1], [0], [0], [1], [0, 0, 1, 1], [], []>} : vector<2x64xf32>, vector<64x256xf32>, vector<2x256xf32> -> vector<2x256xf32>
    %203 = vector.extract_strided_slice %202 {offsets = [0, 128], sizes = [2, 128], strides = [1, 1]} : vector<2x256xf32> to vector<2x128xf32>
    %204 = arith.addf %203, %28 : vector<2x128xf32>
    %205 = arith.negf %204 : vector<2x128xf32>
    %206 = math.exp %205 : vector<2x128xf32>
    %cst_40 = arith.constant 1.000000e+00 : f32
    %207 = vector.broadcast %cst_40 : f32 to vector<2x128xf32>
    %208 = arith.addf %207, %206 : vector<2x128xf32>
    %209 = arith.divf %207, %208 : vector<2x128xf32>
    %210 = math.tanh %204 : vector<2x128xf32>
    %211 = vector.extract_strided_slice %209 {offsets = [0, 0], sizes = [2, 32], strides = [1, 1]} : vector<2x128xf32> to vector<2x32xf32>
    %212 = vector.extract_strided_slice %209 {offsets = [0, 32], sizes = [2, 32], strides = [1, 1]} : vector<2x128xf32> to vector<2x32xf32>
    %213 = vector.extract_strided_slice %210 {offsets = [0, 64], sizes = [2, 32], strides = [1, 1]} : vector<2x128xf32> to vector<2x32xf32>
    %214 = vector.extract_strided_slice %209 {offsets = [0, 96], sizes = [2, 32], strides = [1, 1]} : vector<2x128xf32> to vector<2x32xf32>
    %215 = arith.mulf %212, %181 : vector<2x32xf32>
    %216 = arith.mulf %211, %213 : vector<2x32xf32>
    %217 = arith.addf %215, %216 : vector<2x32xf32>
    %218 = math.tanh %217 : vector<2x32xf32>
    %219 = arith.mulf %214, %218 : vector<2x32xf32>
    %220 = vector.extract_strided_slice %202 {offsets = [0, 0], sizes = [2, 128], strides = [1, 1]} : vector<2x256xf32> to vector<2x128xf32>
    %221 = arith.addf %220, %19 : vector<2x128xf32>
    %222 = arith.negf %221 : vector<2x128xf32>
    %223 = math.exp %222 : vector<2x128xf32>
    %cst_41 = arith.constant 1.000000e+00 : f32
    %224 = vector.broadcast %cst_41 : f32 to vector<2x128xf32>
    %225 = arith.addf %224, %223 : vector<2x128xf32>
    %226 = arith.divf %224, %225 : vector<2x128xf32>
    %227 = math.tanh %221 : vector<2x128xf32>
    %228 = vector.extract_strided_slice %226 {offsets = [0, 0], sizes = [2, 32], strides = [1, 1]} : vector<2x128xf32> to vector<2x32xf32>
    %229 = vector.extract_strided_slice %226 {offsets = [0, 32], sizes = [2, 32], strides = [1, 1]} : vector<2x128xf32> to vector<2x32xf32>
    %230 = vector.extract_strided_slice %227 {offsets = [0, 64], sizes = [2, 32], strides = [1, 1]} : vector<2x128xf32> to vector<2x32xf32>
    %231 = vector.extract_strided_slice %226 {offsets = [0, 96], sizes = [2, 32], strides = [1, 1]} : vector<2x128xf32> to vector<2x32xf32>
    %232 = arith.mulf %229, %198 : vector<2x32xf32>
    %233 = arith.mulf %228, %230 : vector<2x32xf32>
    %234 = arith.addf %232, %233 : vector<2x32xf32>
    %235 = math.tanh %234 : vector<2x32xf32>
    %236 = arith.mulf %231, %235 : vector<2x32xf32>
    %237 = tpu.concatenate %236, %219 in 1 : vector<2x32xf32>, vector<2x32xf32> -> vector<2x64xf32>
    %cst_42 = arith.constant dense<0.000000e+00> : vector<2x256xf32>
    %238 = tpu.matmul %237, %24, %cst_42 {dimension_numbers = #tpu.dot_dimension_numbers<[1], [0], [0], [1], [0, 0, 1, 1], [], []>} : vector<2x64xf32>, vector<64x256xf32>, vector<2x256xf32> -> vector<2x256xf32>
    %239 = vector.extract_strided_slice %238 {offsets = [0, 128], sizes = [2, 128], strides = [1, 1]} : vector<2x256xf32> to vector<2x128xf32>
    %240 = arith.addf %239, %28 : vector<2x128xf32>
    %241 = arith.negf %240 : vector<2x128xf32>
    %242 = math.exp %241 : vector<2x128xf32>
    %cst_43 = arith.constant 1.000000e+00 : f32
    %243 = vector.broadcast %cst_43 : f32 to vector<2x128xf32>
    %244 = arith.addf %243, %242 : vector<2x128xf32>
    %245 = arith.divf %243, %244 : vector<2x128xf32>
    %246 = math.tanh %240 : vector<2x128xf32>
    %247 = vector.extract_strided_slice %245 {offsets = [0, 0], sizes = [2, 32], strides = [1, 1]} : vector<2x128xf32> to vector<2x32xf32>
    %248 = vector.extract_strided_slice %245 {offsets = [0, 32], sizes = [2, 32], strides = [1, 1]} : vector<2x128xf32> to vector<2x32xf32>
    %249 = vector.extract_strided_slice %246 {offsets = [0, 64], sizes = [2, 32], strides = [1, 1]} : vector<2x128xf32> to vector<2x32xf32>
    %250 = vector.extract_strided_slice %245 {offsets = [0, 96], sizes = [2, 32], strides = [1, 1]} : vector<2x128xf32> to vector<2x32xf32>
    %251 = arith.mulf %248, %217 : vector<2x32xf32>
    %252 = arith.mulf %247, %249 : vector<2x32xf32>
    %253 = arith.addf %251, %252 : vector<2x32xf32>
    %254 = math.tanh %253 : vector<2x32xf32>
    %255 = arith.mulf %250, %254 : vector<2x32xf32>
    %256 = vector.extract_strided_slice %238 {offsets = [0, 0], sizes = [2, 128], strides = [1, 1]} : vector<2x256xf32> to vector<2x128xf32>
    %257 = arith.addf %256, %21 : vector<2x128xf32>
    %258 = arith.negf %257 : vector<2x128xf32>
    %259 = math.exp %258 : vector<2x128xf32>
    %cst_44 = arith.constant 1.000000e+00 : f32
    %260 = vector.broadcast %cst_44 : f32 to vector<2x128xf32>
    %261 = arith.addf %260, %259 : vector<2x128xf32>
    %262 = arith.divf %260, %261 : vector<2x128xf32>
    %263 = math.tanh %257 : vector<2x128xf32>
    %264 = vector.extract_strided_slice %262 {offsets = [0, 0], sizes = [2, 32], strides = [1, 1]} : vector<2x128xf32> to vector<2x32xf32>
    %265 = vector.extract_strided_slice %262 {offsets = [0, 32], sizes = [2, 32], strides = [1, 1]} : vector<2x128xf32> to vector<2x32xf32>
    %266 = vector.extract_strided_slice %263 {offsets = [0, 64], sizes = [2, 32], strides = [1, 1]} : vector<2x128xf32> to vector<2x32xf32>
    %267 = vector.extract_strided_slice %262 {offsets = [0, 96], sizes = [2, 32], strides = [1, 1]} : vector<2x128xf32> to vector<2x32xf32>
    %268 = arith.mulf %265, %234 : vector<2x32xf32>
    %269 = arith.mulf %264, %266 : vector<2x32xf32>
    %270 = arith.addf %268, %269 : vector<2x32xf32>
    %271 = math.tanh %270 : vector<2x32xf32>
    %272 = arith.mulf %267, %271 : vector<2x32xf32>
    %273 = tpu.concatenate %272, %255 in 1 : vector<2x32xf32>, vector<2x32xf32> -> vector<2x64xf32>
    %cst_45 = arith.constant dense<0.000000e+00> : vector<2x256xf32>
    %274 = tpu.matmul %273, %24, %cst_45 {dimension_numbers = #tpu.dot_dimension_numbers<[1], [0], [0], [1], [0, 0, 1, 1], [], []>} : vector<2x64xf32>, vector<64x256xf32>, vector<2x256xf32> -> vector<2x256xf32>
    %275 = vector.extract_strided_slice %274 {offsets = [0, 128], sizes = [2, 128], strides = [1, 1]} : vector<2x256xf32> to vector<2x128xf32>
    %276 = arith.addf %275, %28 : vector<2x128xf32>
    %277 = arith.negf %276 : vector<2x128xf32>
    %278 = math.exp %277 : vector<2x128xf32>
    %cst_46 = arith.constant 1.000000e+00 : f32
    %279 = vector.broadcast %cst_46 : f32 to vector<2x128xf32>
    %280 = arith.addf %279, %278 : vector<2x128xf32>
    %281 = arith.divf %279, %280 : vector<2x128xf32>
    %282 = math.tanh %276 : vector<2x128xf32>
    %283 = vector.extract_strided_slice %281 {offsets = [0, 0], sizes = [2, 32], strides = [1, 1]} : vector<2x128xf32> to vector<2x32xf32>
    %284 = vector.extract_strided_slice %281 {offsets = [0, 32], sizes = [2, 32], strides = [1, 1]} : vector<2x128xf32> to vector<2x32xf32>
    %285 = vector.extract_strided_slice %282 {offsets = [0, 64], sizes = [2, 32], strides = [1, 1]} : vector<2x128xf32> to vector<2x32xf32>
    %286 = vector.extract_strided_slice %281 {offsets = [0, 96], sizes = [2, 32], strides = [1, 1]} : vector<2x128xf32> to vector<2x32xf32>
    %287 = arith.mulf %284, %253 : vector<2x32xf32>
    %288 = arith.mulf %283, %285 : vector<2x32xf32>
    %289 = arith.addf %287, %288 : vector<2x32xf32>
    %290 = math.tanh %289 : vector<2x32xf32>
    %291 = arith.mulf %286, %290 : vector<2x32xf32>
    %292 = vector.extract_strided_slice %274 {offsets = [0, 0], sizes = [2, 128], strides = [1, 1]} : vector<2x256xf32> to vector<2x128xf32>
    %293 = arith.addf %292, %23 : vector<2x128xf32>
    %294 = arith.negf %293 : vector<2x128xf32>
    %295 = math.exp %294 : vector<2x128xf32>
    %cst_47 = arith.constant 1.000000e+00 : f32
    %296 = vector.broadcast %cst_47 : f32 to vector<2x128xf32>
    %297 = arith.addf %296, %295 : vector<2x128xf32>
    %298 = arith.divf %296, %297 : vector<2x128xf32>
    %299 = math.tanh %293 : vector<2x128xf32>
    %300 = vector.extract_strided_slice %298 {offsets = [0, 0], sizes = [2, 32], strides = [1, 1]} : vector<2x128xf32> to vector<2x32xf32>
    %301 = vector.extract_strided_slice %298 {offsets = [0, 32], sizes = [2, 32], strides = [1, 1]} : vector<2x128xf32> to vector<2x32xf32>
    %302 = vector.extract_strided_slice %299 {offsets = [0, 64], sizes = [2, 32], strides = [1, 1]} : vector<2x128xf32> to vector<2x32xf32>
    %303 = vector.extract_strided_slice %298 {offsets = [0, 96], sizes = [2, 32], strides = [1, 1]} : vector<2x128xf32> to vector<2x32xf32>
    %304 = arith.mulf %301, %270 : vector<2x32xf32>
    %305 = arith.mulf %300, %302 : vector<2x32xf32>
    %306 = arith.addf %304, %305 : vector<2x32xf32>
    %307 = math.tanh %306 : vector<2x32xf32>
    %308 = arith.mulf %303, %307 : vector<2x32xf32>
    %309 = tpu.concatenate %308, %291 in 1 : vector<2x32xf32>, vector<2x32xf32> -> vector<2x64xf32>
    %cst_48 = arith.constant dense<0.000000e+00> : vector<2x256xf32>
    %310 = tpu.matmul %309, %24, %cst_48 {dimension_numbers = #tpu.dot_dimension_numbers<[1], [0], [0], [1], [0, 0, 1, 1], [], []>} : vector<2x64xf32>, vector<64x256xf32>, vector<2x256xf32> -> vector<2x256xf32>
    %311 = vector.extract_strided_slice %310 {offsets = [0, 128], sizes = [2, 128], strides = [1, 1]} : vector<2x256xf32> to vector<2x128xf32>
    %312 = arith.addf %311, %28 : vector<2x128xf32>
    %313 = arith.negf %312 : vector<2x128xf32>
    %314 = math.exp %313 : vector<2x128xf32>
    %cst_49 = arith.constant 1.000000e+00 : f32
    %315 = vector.broadcast %cst_49 : f32 to vector<2x128xf32>
    %316 = arith.addf %315, %314 : vector<2x128xf32>
    %317 = arith.divf %315, %316 : vector<2x128xf32>
    %318 = math.tanh %312 : vector<2x128xf32>
    %319 = vector.extract_strided_slice %317 {offsets = [0, 0], sizes = [2, 32], strides = [1, 1]} : vector<2x128xf32> to vector<2x32xf32>
    %320 = vector.extract_strided_slice %317 {offsets = [0, 32], sizes = [2, 32], strides = [1, 1]} : vector<2x128xf32> to vector<2x32xf32>
    %321 = vector.extract_strided_slice %318 {offsets = [0, 64], sizes = [2, 32], strides = [1, 1]} : vector<2x128xf32> to vector<2x32xf32>
    %322 = vector.extract_strided_slice %317 {offsets = [0, 96], sizes = [2, 32], strides = [1, 1]} : vector<2x128xf32> to vector<2x32xf32>
    %323 = arith.mulf %320, %289 : vector<2x32xf32>
    %324 = arith.mulf %319, %321 : vector<2x32xf32>
    %325 = arith.addf %323, %324 : vector<2x32xf32>
    %326 = math.tanh %325 : vector<2x32xf32>
    %327 = arith.mulf %322, %326 : vector<2x32xf32>
    %328 = tpu.concatenate %75, %111, %147, %183, %219, %255, %291, %327 in 0 : vector<2x32xf32>, vector<2x32xf32>, vector<2x32xf32>, vector<2x32xf32>, vector<2x32xf32>, vector<2x32xf32>, vector<2x32xf32>, vector<2x32xf32> -> vector<16x32xf32>
    %cst_50 = arith.constant dense<0.000000e+00> : vector<16x4xf32>
    %329 = tpu.matmul %328, %25, %cst_50 {dimension_numbers = #tpu.dot_dimension_numbers<[1], [0], [0], [1], [0, 0, 1, 1], [], []>} : vector<16x32xf32>, vector<32x4xf32>, vector<16x4xf32> -> vector<16x4xf32>
    %330 = vector.broadcast %29 : vector<1x4xf32> to vector<16x4xf32>
    %331 = arith.addf %329, %330 : vector<16x4xf32>
    %c0_51 = arith.constant 0 : index
    %c0_52 = arith.constant 0 : index
    %332 = vector.load %arg9[%c0_51, %c0_52] : memref<16x4xf32, #tpu.memory_space<vmem>>, vector<16x4xf32>
    tpu.vector_store %arg9[%c0_51, %c0_52], %331 {strides = array<i32>} : memref<16x4xf32, #tpu.memory_space<vmem>>, vector<16x4xf32>,
    %c0_53 = arith.constant 0 : index
    %c0_54 = arith.constant 0 : index
    %c0_55 = arith.constant 0 : index
    %333 = vector.load %arg10[%c0_53, %c0_54, %c0_55] : memref<2x2x32xf32, #tpu.memory_space<vmem>>, vector<1x2x32xf32>
    %334 = vector.shape_cast %333 : vector<1x2x32xf32> to vector<2x32xf32>
    %335 = vector.shape_cast %308 : vector<2x32xf32> to vector<1x2x32xf32>
    tpu.vector_store %arg10[%c0_53, %c0_54, %c0_55], %335 {strides = array<i32>} : memref<2x2x32xf32, #tpu.memory_space<vmem>>, vector<1x2x32xf32>,
    %c1_56 = arith.constant 1 : index
    %c0_57 = arith.constant 0 : index
    %c0_58 = arith.constant 0 : index
    %336 = vector.load %arg10[%c1_56, %c0_57, %c0_58] : memref<2x2x32xf32, #tpu.memory_space<vmem>>, vector<1x2x32xf32>
    %337 = vector.shape_cast %336 : vector<1x2x32xf32> to vector<2x32xf32>
    %338 = vector.shape_cast %327 : vector<2x32xf32> to vector<1x2x32xf32>
    tpu.vector_store %arg10[%c1_56, %c0_57, %c0_58], %338 {strides = array<i32>} : memref<2x2x32xf32, #tpu.memory_space<vmem>>, vector<1x2x32xf32>,
    %c0_59 = arith.constant 0 : index
    %c0_60 = arith.constant 0 : index
    %c0_61 = arith.constant 0 : index
    %339 = vector.load %arg11[%c0_59, %c0_60, %c0_61] : memref<2x2x32xf32, #tpu.memory_space<vmem>>, vector<1x2x32xf32>
    %340 = vector.shape_cast %339 : vector<1x2x32xf32> to vector<2x32xf32>
    %341 = vector.shape_cast %306 : vector<2x32xf32> to vector<1x2x32xf32>
    tpu.vector_store %arg11[%c0_59, %c0_60, %c0_61], %341 {strides = array<i32>} : memref<2x2x32xf32, #tpu.memory_space<vmem>>, vector<1x2x32xf32>,
    %c1_62 = arith.constant 1 : index
    %c0_63 = arith.constant 0 : index
    %c0_64 = arith.constant 0 : index
    %342 = vector.load %arg11[%c1_62, %c0_63, %c0_64] : memref<2x2x32xf32, #tpu.memory_space<vmem>>, vector<1x2x32xf32>
    %343 = vector.shape_cast %342 : vector<1x2x32xf32> to vector<2x32xf32>
    %344 = vector.shape_cast %325 : vector<2x32xf32> to vector<1x2x32xf32>
    tpu.vector_store %arg11[%c1_62, %c0_63, %c0_64], %344 {strides = array<i32>} : memref<2x2x32xf32, #tpu.memory_space<vmem>>, vector<1x2x32xf32>,
    return
  }
}

</mosaic_0001>

<bundles_post_ra>
// kernel: net_forward.1
= control target key start
LH: loop header
LB: loop body
LE: loop exit
PB: predicated region body
PF: predicated region fallthrough
CT: control target
= control target key end

     0   :  { %17 = vsyncpa [#allocation3], 0  ;;  %s1910_s23 = smov 32   ;;  %vm54_vm0 = vcmask 1043456   ;;  %v1911_v11 = vmov 0.0   ;;  %vm47_vm1 = vcmask 31744   ;;  %s2365_s0 = inlined_call_operand.vmem [shape: f32[2,8,4], index: 0, kind: input, shape index: {}]   ;;  %s2366_s1 = inlined_call_operand.vmem [shape: f32[2,2,32], index: 1, kind: input, shape index: {}, may-alias: {1,2}]   ;;  %s2367_s2 = inlined_call_operand.vmem [shape: f32[2,2,32], index: 2, kind: input, shape index: {}, may-alias: {1,2}]   ;;  %s2368_s3 = inlined_call_operand.vmem [shape: f32[4,128], index: 3, kind: input, shape index: {}]   ;;  %s2369_s4 = inlined_call_operand.vmem [shape: f32[1,128], index: 4, kind: input, shape index: {}]   ;;  %s2370_s5 = inlined_call_operand.vmem [shape: f32[64,256], index: 5, kind: input, shape index: {}]   ;;  %s2371_s6 = inlined_call_operand.vmem [shape: f32[1,128], index: 6, kind: input, shape index: {}]   ;;  %s2372_s7 = inlined_call_operand.vmem [shape: f32[32,4], index: 7, kind: input, shape index: {}]   ;;  %s2373_s8 = inlined_call_operand.vmem [shape: f32[1,4], index: 8, kind: input, shape index: {}]   ;;  %s2374_s9 = inlined_call_operand.vmem [shape: f32[16,4], index: 9, kind: output, shape index: {0}]   ;;  %s2375_s10 = inlined_call_operand.hbm [shape: f32[2,2,32], index: 10, kind: output, shape index: {1}]   ;;  %s2376_s11 = inlined_call_operand.hbm [shape: f32[2,2,32], index: 11, kind: output, shape index: {2}]  }
   0x1   :  { %v1520_v0 = vld [vmem:[%s2366_s1 + $0x2] sm:$0x3]  ;;  %v134_v1 = vld [vmem:[%s2370_s5 + $0x8] sm:$0xff]  ;;  %v136_v2 = vld [vmem:[%s2370_s5 + $0x18] sm:$0xff]  ;;  %241 = vmatprep.mubr.f32.mxu1 %v1911_v11 }
   0x2   :  { %168 = vrot.lane.b32.xlu0 %v1520_v0, %s1910_s23  ;;  %v1987_v3 = vpack.c.bf16 %v136_v2, %v134_v1  ;;  %v133_v4 = vld [vmem:[%s2370_s5] sm:$0xff]  ;;  %v135_v5 = vld [vmem:[%s2370_s5 + $0x10] sm:$0xff]  ;;  %v138_v6 = vld [vmem:[%s2370_s5 + $0x28] sm:$0xff] }
   0x3   :  { %v1998_v7 = vpack.c.bf16 %v135_v5, %v133_v4  ;;  %v140_v8 = vld [vmem:[%s2370_s5 + $0x38] sm:$0xff]  ;;  %v137_v9 = vld [vmem:[%s2370_s5 + $0x20] sm:$0xff]  ;;  %v139_v10 = vld [vmem:[%s2370_s5 + $0x30] sm:$0xff] }
   0x4   :  { %1576 = vmatprep.subr.bf16.mxu1 %v1987_v3  ;;  %v2011_v12 = vpack.c.bf16 %v140_v8, %v138_v6  ;;  %v39_v13 = vld [vmem:[%s2368_s3] sm:$0xf]  ;;  %v2020_v15 = vpack.c.bf16 %v139_v10, %v137_v9  ;;  %v38_v16 = vld [vmem:[%s2365_s0 + $0x8] sm:$0xff]  ;;  %v144_v18 = vld [vmem:[%s2370_s5 + $0x58] sm:$0xff] }
   0x5   :  { %v37_v14 = vld [vmem:[%s2365_s0] sm:$0xff]  ;;  %1578 = vmatpush1.bf16.msra.mxu1 %v1998_v7  ;;  %1559 = vmatprep.subr.msk.mxu0 %vm54_vm0, %v39_v13  ;;  %v142_v17 = vld [vmem:[%s2370_s5 + $0x48] sm:$0xff]  ;;  %v143_v21 = vld [vmem:[%s2370_s5 + $0x50] sm:$0xff] }
   0x6   :  { %1580 = vmatprep.subr.bf16.mxu1 %v2011_v12  ;;  %1560 = vmatpush3.msk.msra.mxu0 %vm54_vm0, %v39_v13  ;;  %v2034_v19 = vpack.c.bf16 %v144_v18, %v142_v17  ;;  %v141_v20 = vld [vmem:[%s2370_s5 + $0x40] sm:$0xff]  ;;  %v146_v22 = vld [vmem:[%s2370_s5 + $0x68] sm:$0xff]  ;;  %v148_v23 = vld [vmem:[%s2370_s5 + $0x78] sm:$0xff] }
   0x7   :  { %1561 = vmatprep.mubr.msk.f32.mxu0 %vm47_vm1, %v37_v14  ;;  %1592 = vmatprep.subr.bf16.mxu0 %v1987_v3  ;;  %v162_v24 = vld [vmem:[%s2367_s2] sm:$0x3] }
   0x8   :  { %1562 = vmatmul.mubr.msk.f32.vlgmr.msra.gmra.mrb[0].mxu0 %vm47_vm1, %v38_v16 }
   0x9   :  { %18 = vsyncpa [#allocation5], 0  ;;  %1582 = vmatpush1.bf16.msra.mxu1 %v2020_v15  ;;  %v2055_v25 = vpack.c.bf16 %v143_v21, %v141_v20  ;;  %262 = vrot.lane.b32.xlu1 %v162_v24, %s1910_s23  ;;  %v2059_v26 = vpack.c.bf16 %v148_v23, %v146_v22  ;;  %v145_v27 = vld [vmem:[%s2370_s5 + $0x60] sm:$0xff]  ;;  %v147_v28 = vld [vmem:[%s2370_s5 + $0x70] sm:$0xff]  ;;  %vm171_vm2 = vcmask 261120   ;;  %vm173_vm3 = vcmask 523264  }
   0xa   :  { %1584 = vmatprep.subr.bf16.mxu1 %v2034_v19  ;;  %1594 = vmatpush1.bf16.msra.mxu0 %v1998_v7  ;;  %v2071_v29 = vpack.c.bf16 %v147_v28, %v145_v27  ;;  %v161_v30 = vld [vmem:[%s2366_s1] sm:$0x3]  ;;  %vm250_vm4 = vcmask 1041409   ;;  %vm1360_vm5 = vcmask 1041408   ;;  %vm1363_vm6 = vcmask 1045504   ;;  %s1913_s13 = smov 96  }
   0xb   :  { %1596 = vmatprep.subr.bf16.mxu0 %v2011_v12  ;;  %354 = vmatprep.mubr.f32.mxu0 %v1911_v11  ;;  %v1515_v33 = vld [vmem:[%s2369_s4] ss:$0 sm:$0xff]  ;;  %s1912_s4 = smov 64   ;;  %vm1461_vm7 = vcmask 254976   ;;  %s1915_s15 = smov [#allocation4]  }
   0xc   :  { %v2141_v21 = vld [vmem:[%s2371_s6] ss:$0 sm:$0xff]  ;;  %s1498_s16 = sshll.u32 %s1915_s15, 4  ;;  %s1499_s16 = int_to_ptr.vmem [resolvable:$true] %s1498_s16 }
   0xd   :  { %1586 = vmatpush1.bf16.msra.mxu1 %v2055_v25 }
   0xe   :  { %1588 = vmatprep.subr.bf16.mxu1 %v2059_v26  ;;  %1598 = vmatpush1.bf16.msra.mxu0 %v2020_v15 }
   0xf   :  { %1600 = vmatprep.subr.bf16.mxu0 %v2034_v19 }
  0x11   :  { %1590 = vmatpush1.bf16.msra.mxu1 %v2071_v29 }
  0x12   :  { %1602 = vmatpush1.bf16.msra.mxu0 %v2055_v25  ;;  %1608 = vmatprep.subr.bf16.mxu1 %v1987_v3 }
  0x13   :  { %1604 = vmatprep.subr.bf16.mxu0 %v2059_v26 }
  0x16   :  { %1606 = vmatpush1.bf16.msra.mxu0 %v2071_v29 }
  0x17   :  { %1624 = vmatprep.subr.bf16.mxu0 %v1987_v3 }
  0x74   :  { %v2085_v31 = vpop.permute.xlu0 %168 }
  0x75   :  { %v172_v32 = vsel %vm171_vm2, %v161_v30, %v2085_v31 }
  0x76   :  { %1522 = vmatmul.mubr.msk.f32.vlgmr.msra.gmra.mrb[0].mxu1 %vm173_vm3, %v172_v32 }
  0x77   :  { %1610 = vmatpush1.bf16.msra.mxu1 %v1998_v7  ;;  %494 = vmatprep.mubr.f32.mxu1 %v1911_v11 }
  0x78   :  { %1612 = vmatprep.subr.bf16.mxu1 %v2011_v12 }
  0x7b   :  { %1614 = vmatpush1.bf16.msra.mxu1 %v2020_v15  ;;  %v263_v8 = vpop.permute.xlu1 %262 }
  0x7c   :  { %1616 = vmatprep.subr.bf16.mxu1 %v2034_v19 }
  0x7f   :  { %1618 = vmatpush1.bf16.msra.mxu1 %v2055_v25 }
  0x80   :  { %1620 = vmatprep.subr.bf16.mxu1 %v2059_v26 }
  0x83   :  { %1622 = vmatpush1.bf16.msra.mxu1 %v2071_v29 }
  0x84   :  { %1640 = vmatprep.subr.bf16.mxu1 %v1987_v3 }
  0xdb   :  { %v1563_v34 = vpop.f32.mrb[0].mxu0 }
  0xdc   :  { %v130_v35 = vadd.f32 %v1563_v34, %v1515_v33  ;;  %v124_v36 = vpop.f32.mrb[1].mxu0 }
  0xdd   :  { %v125_v37 = vadd.f32 %v1515_v33, %v124_v36 }
  0xde   :  { %v249_v38 = vrot.slane %v130_v35, 7  ;;  %v527_v39 = vrot.slane %v130_v35, 1  ;;  %v664_v40 = vrot.slane %v130_v35, 2  ;;  %v801_v41 = vrot.slane %v130_v35, 3 }
  0xdf   :  { %v390_v42 = vrot.slane %v125_v37, 1  ;;  %v526_v43 = vrot.slane %v125_v37, 2  ;;  %v663_v44 = vrot.slane %v125_v37, 3  ;;  %v800_v45 = vrot.slane %v125_v37, 4 }
  0xe0   :  { %v251_v46 = vsel %vm250_vm4, %v249_v38, %v125_v37  ;;  %v937_v47 = vrot.slane %v125_v37, 5  ;;  %v938_v48 = vrot.slane %v130_v35, 4  ;;  %v1074_v49 = vrot.slane %v125_v37, 6 }
  0xe1   :  { %v391_v50 = vsel %vm250_vm4, %v130_v35, %v390_v42  ;;  %v2105_v51 = vsel %vm250_vm4, %v527_v39, %v526_v43  ;;  %v2108_v52 = vsel %vm250_vm4, %v664_v40, %v663_v44  ;;  %v2111_v53 = vsel %vm250_vm4, %v801_v41, %v800_v45 }
  0xe2   :  { %v2114_v54 = vsel %vm250_vm4, %v938_v48, %v937_v47  ;;  %v1075_v55 = vrot.slane %v130_v35, 5  ;;  %v1211_v56 = vrot.slane %v125_v37, 7  ;;  %v1212_v57 = vrot.slane %v130_v35, 6 }
  0xe4   :  { %v2117_v58 = vsel %vm250_vm4, %v1075_v55, %v1074_v49  ;;  %v2120_v59 = vsel %vm250_vm4, %v1212_v57, %v1211_v56 }
 0x149   :  { %v243_v60 = vpop.f32.mrb[0].mxu1 }
 0x14a   :  { %v253_v61 = vadd.f32 %v251_v46, %v243_v60  ;;  %v245_v62 = vpop.f32.mrb[1].mxu1 }
 0x14c   :  { %1734 = vtanh.f32 %v253_v61  ;;  %v1523_v0 = vmul.f32 -1.442695, %v253_v61 }
 0x14e   :  { %1736 = vpow2.f32 %v1523_v0 }
 0x156   :  { %v1735_v63 = vpop.eup %1734 }
 0x157   :  { %267 = vrot.lane.b32.xlu0 %v1735_v63, %s1912_s4 }
 0x158   :  { %v1737_v1 = vpop.eup %1736 }
 0x159   :  { %v257_v2 = vadd.f32 1.0, %v1737_v1 }
 0x15b   :  { %1738 = vrcp.f32 %v257_v2 }
 0x165   :  { %v1739_v4 = vpop.eup %1738 }
 0x166   :  { %v265_v9 = vmul.f32 %v1739_v4, %v263_v8 }
 0x1c9   :  { %v268_v5 = vpop.permute.xlu0 %267 }
 0x1ca   :  { %v270_v6 = vmul.f32 %v1739_v4, %v268_v5 }
 0x1cc   :  { %272 = vrot.lane.b32.xlu1 %v270_v6, %s1910_s23 }
 0x23e   :  { %v273_v10 = vpop.permute.xlu1 %272 }
 0x23f   :  { %v275_v13 = vadd.f32 %v273_v10, %v265_v9 }
 0x241   :  { %1740 = vtanh.f32 %v275_v13 }
 0x24b   :  { %v1741_v14 = vpop.eup %1740 }
 0x24c   :  { %278 = vrot.lane.b32.xlu0 %v1741_v14, %s1912_s4 }
 0x2be   :  { %v279_v16 = vpop.permute.xlu0 %278 }
 0x2bf   :  { %v281_v17 = vmul.f32 %v1739_v4, %v279_v16 }
 0x2c1   :  { %283 = vrot.lane.b32.xlu1 %v281_v17, %s1910_s23 }
 0x333   :  { %v284_v18 = vpop.permute.xlu1 %283 }
 0x334   :  { %v286_v20 = vsel %vm171_vm2, %v284_v18, %v2085_v31  ;;  %v1521_v31 = vld [vmem:[%s2367_s2 + $0x2] sm:$0x3] }
 0x335   :  { %1524 = vmatmul.mubr.msk.f32.vlgmr.msra.gmra.mrb[2].mxu0 %vm173_vm3, %v286_v20 }
 0x336   :  { %1626 = vmatpush1.bf16.msra.mxu0 %v1998_v7  ;;  %631 = vmatprep.mubr.f32.mxu0 %v1911_v11 }
 0x337   :  { %1628 = vmatprep.subr.bf16.mxu0 %v2011_v12 }
 0x33a   :  { %1630 = vmatpush1.bf16.msra.mxu0 %v2020_v15 }
 0x33b   :  { %1632 = vmatprep.subr.bf16.mxu0 %v2034_v19 }
 0x33e   :  { %1634 = vmatpush1.bf16.msra.mxu0 %v2055_v25 }
 0x33f   :  { %1636 = vmatprep.subr.bf16.mxu0 %v2059_v26 }
 0x342   :  { %1638 = vmatpush1.bf16.msra.mxu0 %v2071_v29 }
 0x343   :  { %1656 = vmatprep.subr.bf16.mxu0 %v1987_v3 }
 0x408   :  { %v356_v22 = vpop.f32.mrb[2].mxu0 }
 0x409   :  { %v393_v23 = vadd.f32 %v391_v50, %v356_v22  ;;  %v358_v24 = vpop.f32.mrb[3].mxu0 }
 0x40a   :  { %v361_v27 = vadd.f32 %v2141_v21, %v358_v24 }
 0x40b   :  { %1742 = vtanh.f32 %v393_v23  ;;  %v1526_v32 = vmul.f32 -1.442695, %v393_v23 }
 0x40c   :  { %1744 = vtanh.f32 %v361_v27  ;;  %v1525_v33 = vmul.f32 -1.442695, %v361_v27 }
 0x40d   :  { %1746 = vpow2.f32 %v1526_v32 }
 0x40e   :  { %1748 = vpow2.f32 %v1525_v33 }
 0x415   :  { %v1743_v28 = vpop.eup %1742 }
 0x416   :  { %v1745_v30 = vpop.eup %1744  ;;  %403 = vrot.lane.b32.xlu1 %v1743_v28, %s1912_s4 }
 0x417   :  { %375 = vrot.lane.b32.xlu0 %v1745_v30, %s1912_s4  ;;  %v1747_v34 = vpop.eup %1746 }
 0x418   :  { %v1749_v35 = vpop.eup %1748  ;;  %v397_v36 = vadd.f32 1.0, %v1747_v34 }
 0x419   :  { %v365_v37 = vadd.f32 1.0, %v1749_v35 }
 0x41a   :  { %1750 = vrcp.f32 %v397_v36 }
 0x41b   :  { %370 = vrot.lane.b32.xlu0 %v1521_v31, %s1910_s23  ;;  %1752 = vrcp.f32 %v365_v37 }
 0x424   :  { %v1751_v38 = vpop.eup %1750 }
 0x425   :  { %v1753_v40 = vpop.eup %1752  ;;  %v401_v45 = vmul.f32 %v1751_v38, %v275_v13 }
 0x488   :  { %v404_v39 = vpop.permute.xlu1 %403 }
 0x489   :  { %v406_v41 = vmul.f32 %v1751_v38, %v404_v39  ;;  %v376_v42 = vpop.permute.xlu0 %375 }
 0x48a   :  { %v378_v43 = vmul.f32 %v1753_v40, %v376_v42 }
 0x48b   :  { %408 = vrot.lane.b32.xlu0 %v406_v41, %s1910_s23 }
 0x48c   :  { %380 = vrot.lane.b32.xlu1 %v378_v43, %s1910_s23 }
 0x48d   :  { %v371_v44 = vpop.permute.xlu0 %370 }
 0x48e   :  { %v373_v46 = vmul.f32 %v1753_v40, %v371_v44 }
 0x4fd   :  { %v409_v47 = vpop.permute.xlu0 %408 }
 0x4fe   :  { %v411_v48 = vadd.f32 %v409_v47, %v401_v45  ;;  %v381_v49 = vpop.permute.xlu1 %380 }
 0x4ff   :  { %v383_v50 = vadd.f32 %v381_v49, %v373_v46 }
 0x500   :  { %1754 = vtanh.f32 %v411_v48 }
 0x501   :  { %1756 = vtanh.f32 %v383_v50 }
 0x50a   :  { %v1755_v55 = vpop.eup %1754 }
 0x50b   :  { %v1757_v56 = vpop.eup %1756  ;;  %414 = vrot.lane.b32.xlu0 %v1755_v55, %s1912_s4 }
 0x50c   :  { %386 = vrot.lane.b32.xlu1 %v1757_v56, %s1912_s4 }
 0x57d   :  { %v415_v57 = vpop.permute.xlu0 %414 }
 0x57e   :  { %v417_v60 = vmul.f32 %v1751_v38, %v415_v57  ;;  %v387_v61 = vpop.permute.xlu1 %386 }
 0x57f   :  { %v2154_v62 = vmul.f32 %v1753_v40, %v387_v61 }
 0x580   :  { %419 = vrot.lane.b32.xlu1 %v417_v60, %s1910_s23 }
 0x581   :  { %423 = vrot.lane.b32.xlu0 %v2154_v62, %s1912_s4 }
 0x5f2   :  { %v420_v63 = vpop.permute.xlu1 %419 }
 0x5f3   :  { %v424_v0 = vpop.permute.xlu0 %423 }
 0x5f4   :  { %v426_v1 = vsel %vm171_vm2, %v420_v63, %v424_v0 }
 0x5f5   :  { %1527 = vmatmul.mubr.msk.f32.vlgmr.msra.gmra.mrb[2].mxu1 %vm173_vm3, %v426_v1 }
 0x5f6   :  { %1642 = vmatpush1.bf16.msra.mxu1 %v1998_v7  ;;  %768 = vmatprep.mubr.f32.mxu1 %v1911_v11 }
 0x5f7   :  { %1644 = vmatprep.subr.bf16.mxu1 %v2011_v12 }
 0x5fa   :  { %1646 = vmatpush1.bf16.msra.mxu1 %v2020_v15 }
 0x5fb   :  { %1648 = vmatprep.subr.bf16.mxu1 %v2034_v19 }
 0x5fe   :  { %1650 = vmatpush1.bf16.msra.mxu1 %v2055_v25 }
 0x5ff   :  { %1652 = vmatprep.subr.bf16.mxu1 %v2059_v26 }
 0x602   :  { %1654 = vmatpush1.bf16.msra.mxu1 %v2071_v29 }
 0x603   :  { %1672 = vmatprep.subr.bf16.mxu1 %v1987_v3 }
 0x6c8   :  { %v496_v2 = vpop.f32.mrb[2].mxu1 }
 0x6c9   :  { %v530_v4 = vadd.f32 %v2105_v51, %v496_v2  ;;  %v498_v5 = vpop.f32.mrb[3].mxu1 }
 0x6ca   :  { %v501_v6 = vadd.f32 %v2141_v21, %v498_v5 }
 0x6cb   :  { %1758 = vtanh.f32 %v530_v4  ;;  %v1529_v10 = vmul.f32 -1.442695, %v530_v4 }
 0x6cc   :  { %1760 = vtanh.f32 %v501_v6  ;;  %v1528_v13 = vmul.f32 -1.442695, %v501_v6 }
 0x6cd   :  { %1762 = vpow2.f32 %v1529_v10 }
 0x6ce   :  { %1764 = vpow2.f32 %v1528_v13 }
 0x6d5   :  { %v1759_v8 = vpop.eup %1758 }
 0x6d6   :  { %v1761_v9 = vpop.eup %1760  ;;  %540 = vrot.lane.b32.xlu0 %v1759_v8, %s1912_s4 }
 0x6d7   :  { %511 = vrot.lane.b32.xlu1 %v1761_v9, %s1912_s4  ;;  %v1763_v14 = vpop.eup %1762 }
 0x6d8   :  { %v1765_v16 = vpop.eup %1764  ;;  %v534_v17 = vadd.f32 1.0, %v1763_v14 }
 0x6d9   :  { %v505_v18 = vadd.f32 1.0, %v1765_v16 }
 0x6da   :  { %1766 = vrcp.f32 %v534_v17 }
 0x6db   :  { %1768 = vrcp.f32 %v505_v18 }
 0x6e4   :  { %v1767_v51 = vpop.eup %1766 }
 0x6e5   :  { %v1769_v22 = vpop.eup %1768  ;;  %v538_v28 = vmul.f32 %v1767_v51, %v411_v48 }
 0x6e6   :  { %v509_v31 = vmul.f32 %v1769_v22, %v383_v50 }
 0x748   :  { %v541_v20 = vpop.permute.xlu0 %540 }
 0x749   :  { %v543_v23 = vmul.f32 %v1767_v51, %v541_v20  ;;  %v512_v24 = vpop.permute.xlu1 %511 }
 0x74a   :  { %v514_v27 = vmul.f32 %v1769_v22, %v512_v24 }
 0x74b   :  { %545 = vrot.lane.b32.xlu0 %v543_v23, %s1910_s23 }
 0x74c   :  { %516 = vrot.lane.b32.xlu1 %v514_v27, %s1910_s23 }
 0x7bd   :  { %v546_v30 = vpop.permute.xlu0 %545 }
 0x7be   :  { %v548_v32 = vadd.f32 %v546_v30, %v538_v28  ;;  %v517_v33 = vpop.permute.xlu1 %516 }
 0x7bf   :  { %v519_v34 = vadd.f32 %v517_v33, %v509_v31 }
 0x7c0   :  { %1770 = vtanh.f32 %v548_v32 }
 0x7c1   :  { %1772 = vtanh.f32 %v519_v34 }
 0x7ca   :  { %v1771_v35 = vpop.eup %1770 }
 0x7cb   :  { %v1773_v36 = vpop.eup %1772  ;;  %551 = vrot.lane.b32.xlu0 %v1771_v35, %s1912_s4 }
 0x7cc   :  { %522 = vrot.lane.b32.xlu1 %v1773_v36, %s1912_s4 }
 0x83d   :  { %v552_v37 = vpop.permute.xlu0 %551 }
 0x83e   :  { %v554_v38 = vmul.f32 %v1767_v51, %v552_v37  ;;  %v523_v39 = vpop.permute.xlu1 %522 }
 0x83f   :  { %v2178_v40 = vmul.f32 %v1769_v22, %v523_v39 }
 0x840   :  { %556 = vrot.lane.b32.xlu1 %v554_v38, %s1910_s23 }
 0x841   :  { %560 = vrot.lane.b32.xlu0 %v2178_v40, %s1912_s4  ;;  %v1347_v18 = vrot.slane %v2178_v40, 6 }
 0x843   :  { %v1361_v24 = vsel %vm1360_vm5, %v2154_v62, %v1347_v18 }
 0x8b2   :  { %v557_v41 = vpop.permute.xlu1 %556 }
 0x8b3   :  { %v561_v42 = vpop.permute.xlu0 %560 }
 0x8b4   :  { %v563_v43 = vsel %vm171_vm2, %v557_v41, %v561_v42 }
 0x8b5   :  { %1530 = vmatmul.mubr.msk.f32.vlgmr.msra.gmra.mrb[4].mxu0 %vm173_vm3, %v563_v43 }
 0x8b6   :  { %1658 = vmatpush1.bf16.msra.mxu0 %v1998_v7  ;;  %905 = vmatprep.mubr.f32.mxu0 %v1911_v11 }
 0x8b7   :  { %1660 = vmatprep.subr.bf16.mxu0 %v2011_v12 }
 0x8ba   :  { %1662 = vmatpush1.bf16.msra.mxu0 %v2020_v15 }
 0x8bb   :  { %1664 = vmatprep.subr.bf16.mxu0 %v2034_v19 }
 0x8be   :  { %1666 = vmatpush1.bf16.msra.mxu0 %v2055_v25 }
 0x8bf   :  { %1668 = vmatprep.subr.bf16.mxu0 %v2059_v26 }
 0x8c2   :  { %1670 = vmatpush1.bf16.msra.mxu0 %v2071_v29 }
 0x8c3   :  { %1688 = vmatprep.subr.bf16.mxu0 %v1987_v3 }
 0x988   :  { %v633_v44 = vpop.f32.mrb[4].mxu0 }
 0x989   :  { %v667_v45 = vadd.f32 %v2108_v52, %v633_v44  ;;  %v635_v46 = vpop.f32.mrb[5].mxu0 }
 0x98a   :  { %v638_v47 = vadd.f32 %v2141_v21, %v635_v46 }
 0x98b   :  { %1774 = vtanh.f32 %v667_v45  ;;  %v1532_v50 = vmul.f32 -1.442695, %v667_v45 }
 0x98c   :  { %1776 = vtanh.f32 %v638_v47  ;;  %v1531_v55 = vmul.f32 -1.442695, %v638_v47 }
 0x98d   :  { %1778 = vpow2.f32 %v1532_v50 }
 0x98e   :  { %1780 = vpow2.f32 %v1531_v55 }
 0x995   :  { %v1775_v48 = vpop.eup %1774 }
 0x996   :  { %v1777_v49 = vpop.eup %1776  ;;  %677 = vrot.lane.b32.xlu0 %v1775_v48, %s1912_s4 }
 0x997   :  { %648 = vrot.lane.b32.xlu1 %v1777_v49, %s1912_s4  ;;  %v1779_v56 = vpop.eup %1778 }
 0x998   :  { %v1781_v57 = vpop.eup %1780  ;;  %v671_v60 = vadd.f32 1.0, %v1779_v56 }
 0x999   :  { %v642_v61 = vadd.f32 1.0, %v1781_v57 }
 0x99a   :  { %1782 = vrcp.f32 %v671_v60 }
 0x99b   :  { %1784 = vrcp.f32 %v642_v61 }
 0x9a4   :  { %v1783_v52 = vpop.eup %1782 }
 0x9a5   :  { %v1785_v0 = vpop.eup %1784  ;;  %v675_v5 = vmul.f32 %v1783_v52, %v548_v32 }
 0x9a6   :  { %v646_v8 = vmul.f32 %v1785_v0, %v519_v34 }
 0xa08   :  { %v678_v63 = vpop.permute.xlu0 %677 }
 0xa09   :  { %v680_v1 = vmul.f32 %v1783_v52, %v678_v63  ;;  %v649_v2 = vpop.permute.xlu1 %648 }
 0xa0a   :  { %v651_v4 = vmul.f32 %v1785_v0, %v649_v2 }
 0xa0b   :  { %682 = vrot.lane.b32.xlu0 %v680_v1, %s1910_s23 }
 0xa0c   :  { %653 = vrot.lane.b32.xlu1 %v651_v4, %s1910_s23 }
 0xa7d   :  { %v683_v6 = vpop.permute.xlu0 %682 }
 0xa7e   :  { %v685_v9 = vadd.f32 %v683_v6, %v675_v5  ;;  %v654_v10 = vpop.permute.xlu1 %653 }
 0xa7f   :  { %v656_v13 = vadd.f32 %v654_v10, %v646_v8 }
 0xa80   :  { %1786 = vtanh.f32 %v685_v9 }
 0xa81   :  { %1788 = vtanh.f32 %v656_v13 }
 0xa8a   :  { %v1787_v14 = vpop.eup %1786 }
 0xa8b   :  { %v1789_v16 = vpop.eup %1788  ;;  %688 = vrot.lane.b32.xlu0 %v1787_v14, %s1912_s4 }
 0xa8c   :  { %659 = vrot.lane.b32.xlu1 %v1789_v16, %s1912_s4 }
 0xafd   :  { %v689_v17 = vpop.permute.xlu0 %688 }
 0xafe   :  { %v691_v51 = vmul.f32 %v1783_v52, %v689_v17  ;;  %v660_v20 = vpop.permute.xlu1 %659 }
 0xaff   :  { %v662_v22 = vmul.f32 %v1785_v0, %v660_v20 }
 0xb00   :  { %693 = vrot.lane.b32.xlu1 %v691_v51, %s1910_s23 }
 0xb01   :  { %v1349_v23 = vrot.slane %v662_v22, 4  ;;  %697 = vrot.lane.b32.xlu0 %v662_v22, %s1912_s4 }
 0xb03   :  { %v2208_v27 = vsel %vm54_vm0, %v1361_v24, %v1349_v23 }
 0xb72   :  { %v694_v28 = vpop.permute.xlu1 %693 }
 0xb73   :  { %v698_v30 = vpop.permute.xlu0 %697 }
 0xb74   :  { %v700_v31 = vsel %vm171_vm2, %v694_v28, %v698_v30 }
 0xb75   :  { %1533 = vmatmul.mubr.msk.f32.vlgmr.msra.gmra.mrb[4].mxu1 %vm173_vm3, %v700_v31 }
 0xb76   :  { %1674 = vmatpush1.bf16.msra.mxu1 %v1998_v7  ;;  %1042 = vmatprep.mubr.f32.mxu1 %v1911_v11 }
 0xb77   :  { %1676 = vmatprep.subr.bf16.mxu1 %v2011_v12 }
 0xb7a   :  { %1678 = vmatpush1.bf16.msra.mxu1 %v2020_v15 }
 0xb7b   :  { %1680 = vmatprep.subr.bf16.mxu1 %v2034_v19 }
 0xb7e   :  { %1682 = vmatpush1.bf16.msra.mxu1 %v2055_v25 }
 0xb7f   :  { %1684 = vmatprep.subr.bf16.mxu1 %v2059_v26 }
 0xb82   :  { %1686 = vmatpush1.bf16.msra.mxu1 %v2071_v29 }
 0xb83   :  { %1704 = vmatprep.subr.bf16.mxu1 %v1987_v3 }
 0xc48   :  { %v770_v62 = vpop.f32.mrb[4].mxu1 }
 0xc49   :  { %v804_v32 = vadd.f32 %v2111_v53, %v770_v62  ;;  %v772_v33 = vpop.f32.mrb[5].mxu1 }
 0xc4a   :  { %v775_v34 = vadd.f32 %v2141_v21, %v772_v33 }
 0xc4b   :  { %1790 = vtanh.f32 %v804_v32  ;;  %v1535_v37 = vmul.f32 -1.442695, %v804_v32 }
 0xc4c   :  { %1792 = vtanh.f32 %v775_v34  ;;  %v1534_v38 = vmul.f32 -1.442695, %v775_v34 }
 0xc4d   :  { %1794 = vpow2.f32 %v1535_v37 }
 0xc4e   :  { %1796 = vpow2.f32 %v1534_v38 }
 0xc55   :  { %v1791_v35 = vpop.eup %1790 }
 0xc56   :  { %v1793_v36 = vpop.eup %1792  ;;  %814 = vrot.lane.b32.xlu0 %v1791_v35, %s1912_s4 }
 0xc57   :  { %785 = vrot.lane.b32.xlu1 %v1793_v36, %s1912_s4  ;;  %v1795_v39 = vpop.eup %1794 }
 0xc58   :  { %v1797_v3 = vpop.eup %1796  ;;  %v808_v40 = vadd.f32 1.0, %v1795_v39 }
 0xc59   :  { %v779_v41 = vadd.f32 1.0, %v1797_v3 }
 0xc5a   :  { %1798 = vrcp.f32 %v808_v40 }
 0xc5b   :  { %1800 = vrcp.f32 %v779_v41 }
 0xc64   :  { %v1799_v53 = vpop.eup %1798 }
 0xc65   :  { %v1801_v43 = vpop.eup %1800  ;;  %v812_v47 = vmul.f32 %v1799_v53, %v685_v9 }
 0xc66   :  { %v783_v49 = vmul.f32 %v1801_v43, %v656_v13 }
 0xcc8   :  { %v815_v42 = vpop.permute.xlu0 %814 }
 0xcc9   :  { %v817_v44 = vmul.f32 %v1799_v53, %v815_v42  ;;  %v786_v45 = vpop.permute.xlu1 %785 }
 0xcca   :  { %v788_v46 = vmul.f32 %v1801_v43, %v786_v45 }
 0xccb   :  { %819 = vrot.lane.b32.xlu0 %v817_v44, %s1910_s23 }
 0xccc   :  { %790 = vrot.lane.b32.xlu1 %v788_v46, %s1910_s23 }
 0xd3d   :  { %v820_v48 = vpop.permute.xlu0 %819 }
 0xd3e   :  { %v822_v50 = vadd.f32 %v820_v48, %v812_v47  ;;  %v791_v55 = vpop.permute.xlu1 %790 }
 0xd3f   :  { %v793_v56 = vadd.f32 %v791_v55, %v783_v49 }
 0xd40   :  { %1802 = vtanh.f32 %v822_v50 }
 0xd41   :  { %1804 = vtanh.f32 %v793_v56 }
 0xd4a   :  { %v1803_v57 = vpop.eup %1802 }
 0xd4b   :  { %v1805_v60 = vpop.eup %1804  ;;  %825 = vrot.lane.b32.xlu0 %v1803_v57, %s1912_s4 }
 0xd4c   :  { %796 = vrot.lane.b32.xlu1 %v1805_v60, %s1912_s4 }
 0xdbd   :  { %v826_v61 = vpop.permute.xlu0 %825 }
 0xdbe   :  { %v828_v52 = vmul.f32 %v1799_v53, %v826_v61  ;;  %v797_v63 = vpop.permute.xlu1 %796 }
 0xdbf   :  { %v799_v0 = vmul.f32 %v1801_v43, %v797_v63 }
 0xdc0   :  { %830 = vrot.lane.b32.xlu1 %v828_v52, %s1910_s23 }
 0xdc1   :  { %v1351_v1 = vrot.slane %v799_v0, 2  ;;  %834 = vrot.lane.b32.xlu0 %v799_v0, %s1912_s4 }
 0xdc3   :  { %v2233_v2 = vsel %vm1363_vm6, %v2208_v27, %v1351_v1 }
 0xe32   :  { %v831_v4 = vpop.permute.xlu1 %830 }
 0xe33   :  { %v835_v5 = vpop.permute.xlu0 %834 }
 0xe34   :  { %v837_v6 = vsel %vm171_vm2, %v831_v4, %v835_v5 }
 0xe35   :  { %1536 = vmatmul.mubr.msk.f32.vlgmr.msra.gmra.mrb[6].mxu0 %vm173_vm3, %v837_v6 }
 0xe36   :  { %1690 = vmatpush1.bf16.msra.mxu0 %v1998_v7  ;;  %1179 = vmatprep.mubr.f32.mxu0 %v1911_v11 }
 0xe37   :  { %1692 = vmatprep.subr.bf16.mxu0 %v2011_v12 }
 0xe3a   :  { %1694 = vmatpush1.bf16.msra.mxu0 %v2020_v15 }
 0xe3b   :  { %1696 = vmatprep.subr.bf16.mxu0 %v2034_v19 }
 0xe3e   :  { %1698 = vmatpush1.bf16.msra.mxu0 %v2055_v25 }
 0xe3f   :  { %1700 = vmatprep.subr.bf16.mxu0 %v2059_v26 }
 0xe42   :  { %1702 = vmatpush1.bf16.msra.mxu0 %v2071_v29 }
 0xf08   :  { %v907_v8 = vpop.f32.mrb[6].mxu0 }
 0xf09   :  { %v941_v9 = vadd.f32 %v2114_v54, %v907_v8  ;;  %v909_v10 = vpop.f32.mrb[7].mxu0 }
 0xf0a   :  { %v912_v13 = vadd.f32 %v2141_v21, %v909_v10 }
 0xf0b   :  { %1806 = vtanh.f32 %v941_v9  ;;  %v1538_v17 = vmul.f32 -1.442695, %v941_v9 }
 0xf0c   :  { %1808 = vtanh.f32 %v912_v13  ;;  %v1537_v18 = vmul.f32 -1.442695, %v912_v13 }
 0xf0d   :  { %1810 = vpow2.f32 %v1538_v17 }
 0xf0e   :  { %1812 = vpow2.f32 %v1537_v18 }
 0xf15   :  { %v1807_v14 = vpop.eup %1806 }
 0xf16   :  { %v1809_v16 = vpop.eup %1808  ;;  %951 = vrot.lane.b32.xlu0 %v1807_v14, %s1912_s4 }
 0xf17   :  { %922 = vrot.lane.b32.xlu1 %v1809_v16, %s1912_s4  ;;  %v1811_v51 = vpop.eup %1810 }
 0xf18   :  { %v1813_v20 = vpop.eup %1812  ;;  %v945_v22 = vadd.f32 1.0, %v1811_v51 }
 0xf19   :  { %v916_v23 = vadd.f32 1.0, %v1813_v20 }
 0xf1a   :  { %1814 = vrcp.f32 %v945_v22 }
 0xf1b   :  { %1816 = vrcp.f32 %v916_v23 }
 0xf24   :  { %v1815_v54 = vpop.eup %1814 }
 0xf25   :  { %v1817_v27 = vpop.eup %1816  ;;  %v949_v62 = vmul.f32 %v1815_v54, %v822_v50 }
 0xf26   :  { %v920_v33 = vmul.f32 %v1817_v27, %v793_v56 }
 0xf88   :  { %v952_v24 = vpop.permute.xlu0 %951 }
 0xf89   :  { %v954_v28 = vmul.f32 %v1815_v54, %v952_v24  ;;  %v923_v30 = vpop.permute.xlu1 %922 }
 0xf8a   :  { %v925_v31 = vmul.f32 %v1817_v27, %v923_v30 }
 0xf8b   :  { %956 = vrot.lane.b32.xlu0 %v954_v28, %s1910_s23 }
 0xf8c   :  { %927 = vrot.lane.b32.xlu1 %v925_v31, %s1910_s23 }
 0xffd   :  { %v957_v32 = vpop.permute.xlu0 %956 }
 0xffe   :  { %v959_v34 = vadd.f32 %v957_v32, %v949_v62  ;;  %v928_v35 = vpop.permute.xlu1 %927 }
 0xfff   :  { %v930_v36 = vadd.f32 %v928_v35, %v920_v33 }
0x1000   :  { %1818 = vtanh.f32 %v959_v34 }
0x1001   :  { %1820 = vtanh.f32 %v930_v36 }
0x100a   :  { %v1819_v37 = vpop.eup %1818 }
0x100b   :  { %v1821_v38 = vpop.eup %1820  ;;  %962 = vrot.lane.b32.xlu0 %v1819_v37, %s1912_s4 }
0x100c   :  { %933 = vrot.lane.b32.xlu1 %v1821_v38, %s1912_s4 }
0x107d   :  { %v963_v39 = vpop.permute.xlu0 %962 }
0x107e   :  { %v965_v3 = vmul.f32 %v1815_v54, %v963_v39  ;;  %v934_v40 = vpop.permute.xlu1 %933 }
0x107f   :  { %v2253_v41 = vmul.f32 %v1817_v27, %v934_v40 }
0x1080   :  { %967 = vrot.lane.b32.xlu1 %v965_v3, %s1910_s23 }
0x1081   :  { %971 = vrot.lane.b32.xlu0 %v2253_v41, %s1912_s4 }
0x10f2   :  { %v968_v53 = vpop.permute.xlu1 %967 }
0x10f3   :  { %v972_v42 = vpop.permute.xlu0 %971 }
0x10f4   :  { %v974_v43 = vsel %vm171_vm2, %v968_v53, %v972_v42 }
0x10f5   :  { %1539 = vmatmul.mubr.msk.f32.vlgmr.msra.gmra.mrb[6].mxu1 %vm173_vm3, %v974_v43 }
0x10f6   :  { %1706 = vmatpush1.bf16.msra.mxu1 %v1998_v7  ;;  %1316 = vmatprep.mubr.f32.mxu1 %v1911_v11 }
0x10f7   :  { %1708 = vmatprep.subr.bf16.mxu1 %v2011_v12 }
0x10fa   :  { %1710 = vmatpush1.bf16.msra.mxu1 %v2020_v15 }
0x10fb   :  { %1712 = vmatprep.subr.bf16.mxu1 %v2034_v19 }
0x10fe   :  { %1714 = vmatpush1.bf16.msra.mxu1 %v2055_v25 }
0x10ff   :  { %1716 = vmatprep.subr.bf16.mxu1 %v2059_v26 }
0x1102   :  { %1718 = vmatpush1.bf16.msra.mxu1 %v2071_v29 }
0x11c8   :  { %v1044_v44 = vpop.f32.mrb[6].mxu1 }
0x11c9   :  { %v1078_v45 = vadd.f32 %v2117_v58, %v1044_v44  ;;  %v1046_v46 = vpop.f32.mrb[7].mxu1 }
0x11ca   :  { %v1049_v7 = vadd.f32 %v2141_v21, %v1046_v46 }
0x11cb   :  { %1822 = vtanh.f32 %v1078_v45  ;;  %v1541_v15 = vmul.f32 -1.442695, %v1078_v45 }
0x11cc   :  { %1824 = vtanh.f32 %v1049_v7  ;;  %v1540_v19 = vmul.f32 -1.442695, %v1049_v7 }
0x11cd   :  { %1826 = vpow2.f32 %v1541_v15 }
0x11ce   :  { %1828 = vpow2.f32 %v1540_v19 }
0x11d5   :  { %v1823_v11 = vpop.eup %1822 }
0x11d6   :  { %v1825_v12 = vpop.eup %1824  ;;  %1088 = vrot.lane.b32.xlu0 %v1823_v11, %s1912_s4 }
0x11d7   :  { %1059 = vrot.lane.b32.xlu1 %v1825_v12, %s1912_s4  ;;  %v1827_v25 = vpop.eup %1826 }
0x11d8   :  { %v1829_v26 = vpop.eup %1828  ;;  %v1082_v29 = vadd.f32 1.0, %v1827_v25 }
0x11d9   :  { %v1053_v47 = vadd.f32 1.0, %v1829_v26 }
0x11da   :  { %1830 = vrcp.f32 %v1082_v29 }
0x11db   :  { %1832 = vrcp.f32 %v1053_v47 }
0x11e4   :  { %v1831_v58 = vpop.eup %1830 }
0x11e5   :  { %v1833_v49 = vpop.eup %1832  ;;  %v1086_v57 = vmul.f32 %v1831_v58, %v959_v34 }
0x11e6   :  { %v1057_v61 = vmul.f32 %v1833_v49, %v930_v36 }
0x1248   :  { %v1089_v48 = vpop.permute.xlu0 %1088 }
0x1249   :  { %v1091_v50 = vmul.f32 %v1831_v58, %v1089_v48  ;;  %v1060_v55 = vpop.permute.xlu1 %1059 }
0x124a   :  { %v1062_v56 = vmul.f32 %v1833_v49, %v1060_v55 }
0x124b   :  { %1093 = vrot.lane.b32.xlu0 %v1091_v50, %s1910_s23 }
0x124c   :  { %1064 = vrot.lane.b32.xlu1 %v1062_v56, %s1910_s23 }
0x12bd   :  { %v1094_v60 = vpop.permute.xlu0 %1093 }
0x12be   :  { %v1096_v52 = vadd.f32 %v1094_v60, %v1086_v57  ;;  %v1065_v63 = vpop.permute.xlu1 %1064 }
0x12bf   :  { %v1067_v0 = vadd.f32 %v1065_v63, %v1057_v61  ;;  %v150_v63 = vld [vmem:[%s2372_s7 + $0x8] sm:$0xff] }
0x12c0   :  { %1834 = vtanh.f32 %v1096_v52 }
0x12c1   :  { %1836 = vtanh.f32 %v1067_v0 }
0x12ca   :  { %v1835_v1 = vpop.eup %1834 }
0x12cb   :  { %v1837_v4 = vpop.eup %1836  ;;  %1099 = vrot.lane.b32.xlu0 %v1835_v1, %s1912_s4  ;;  %v152_v1 = vld [vmem:[%s2372_s7 + $0x18] sm:$0xff] }
0x12cc   :  { %1070 = vrot.lane.b32.xlu1 %v1837_v4, %s1912_s4 }
0x133d   :  { %v1100_v5 = vpop.permute.xlu0 %1099 }
0x133e   :  { %v1102_v6 = vmul.f32 %v1831_v58, %v1100_v5  ;;  %v1071_v8 = vpop.permute.xlu1 %1070 }
0x133f   :  { %v1073_v9 = vmul.f32 %v1833_v49, %v1071_v8 }
0x1340   :  { %1104 = vrot.lane.b32.xlu1 %v1102_v6, %s1910_s23 }
0x1341   :  { %1108 = vrot.lane.b32.xlu0 %v1073_v9, %s1912_s4  ;;  %v1353_v43 = vrot.slane %v1073_v9, 6 }
0x1343   :  { %v1365_v11 = vsel %vm1360_vm5, %v2253_v41, %v1353_v43 }
0x13b2   :  { %v1105_v10 = vpop.permute.xlu1 %1104 }
0x13b3   :  { %v1109_v13 = vpop.permute.xlu0 %1108 }
0x13b4   :  { %v1111_v14 = vsel %vm171_vm2, %v1105_v10, %v1109_v13 }
0x13b5   :  { %1542 = vmatmul.mubr.msk.f32.vlgmr.msra.gmra.mrb[8].mxu0 %vm173_vm3, %v1111_v14 }
0x1488   :  { %v1181_v16 = vpop.f32.mrb[8].mxu0 }
0x1489   :  { %v1215_v17 = vadd.f32 %v2120_v59, %v1181_v16  ;;  %v1183_v18 = vpop.f32.mrb[9].mxu0 }
0x148a   :  { %v1186_v51 = vadd.f32 %v2141_v21, %v1183_v18 }
0x148b   :  { %1838 = vtanh.f32 %v1215_v17  ;;  %v1544_v23 = vmul.f32 -1.442695, %v1215_v17 }
0x148c   :  { %1840 = vtanh.f32 %v1186_v51  ;;  %v1543_v54 = vmul.f32 -1.442695, %v1186_v51 }
0x148d   :  { %1842 = vpow2.f32 %v1544_v23 }
0x148e   :  { %1844 = vpow2.f32 %v1543_v54 }
0x1495   :  { %v1839_v20 = vpop.eup %1838 }
0x1496   :  { %v1841_v22 = vpop.eup %1840  ;;  %1225 = vrot.lane.b32.xlu0 %v1839_v20, %s1912_s4 }
0x1497   :  { %1196 = vrot.lane.b32.xlu1 %v1841_v22, %s1912_s4  ;;  %v1843_v24 = vpop.eup %1842 }
0x1498   :  { %v1845_v27 = vpop.eup %1844  ;;  %v1219_v28 = vadd.f32 1.0, %v1843_v24 }
0x1499   :  { %v1190_v30 = vadd.f32 1.0, %v1845_v27 }
0x149a   :  { %1846 = vrcp.f32 %v1219_v28 }
0x149b   :  { %1848 = vrcp.f32 %v1190_v30 }
0x14a4   :  { %v1847_v59 = vpop.eup %1846 }
0x14a5   :  { %v1849_v62 = vpop.eup %1848  ;;  %v1223_v35 = vmul.f32 %v1847_v59, %v1096_v52  ;;  %v149_v52 = vld [vmem:[%s2372_s7] sm:$0xff] }
0x14a6   :  { %v1194_v37 = vmul.f32 %v1849_v62, %v1067_v0  ;;  %v151_v0 = vld [vmem:[%s2372_s7 + $0x10] sm:$0xff]  ;;  %s1914_s7 = smov [#allocation2]  }
0x14a7   :  { %v1723_v4 = vpack.c.bf16 %v152_v1, %v151_v0  ;;  %s1486_s14 = sshll.u32 %s1914_s7, 4  ;;  %s1487_s14 = int_to_ptr.vmem [resolvable:$true] %s1486_s14 }
0x14a8   :  { %s1862_s17 = scalar_lea.vmem %s1487_s14, 64  ;;  %p1867_p1 = scmp.lt.s32.totalorder %s1487_s14, %s1487_s14 }
0x14a9   :  { %p1863_p0 = scmp.ne.s32.totalorder %s1487_s14, %s1862_s17  ;;  %p1868_p2 = scmp.lt.s32.totalorder %s1862_s17, %s1862_s17 }
0x14ab   :  { %p1869_p3 = por %p1868_p2, %p1867_p1 }
0x14ad   :  { %p1870_p4 = pnand %p1869_p3, %p1863_p0 }
0x1508   :  { %v1226_v31 = vpop.permute.xlu0 %1225 }
0x1509   :  { %v1228_v32 = vmul.f32 %v1847_v59, %v1226_v31  ;;  %v1197_v33 = vpop.permute.xlu1 %1196 }
0x150a   :  { %v1199_v34 = vmul.f32 %v1849_v62, %v1197_v33 }
0x150b   :  { %1230 = vrot.lane.b32.xlu0 %v1228_v32, %s1910_s23 }
0x150c   :  { %1201 = vrot.lane.b32.xlu1 %v1199_v34, %s1910_s23 }
0x157d   :  { %v1231_v36 = vpop.permute.xlu0 %1230 }
0x157e   :  { %v2286_v38 = vadd.f32 %v1231_v36, %v1223_v35  ;;  %v1202_v39 = vpop.permute.xlu1 %1201 }
0x157f   :  { %v1204_v3 = vadd.f32 %v1202_v39, %v1194_v37 }
0x1580   :  { %1850 = vtanh.f32 %v2286_v38 }
0x1581   :  { %1852 = vtanh.f32 %v1204_v3 }
0x158a   :  { %v1851_v40 = vpop.eup %1850 }
0x158b   :  { %v1853_v53 = vpop.eup %1852  ;;  %1236 = vrot.lane.b32.xlu0 %v1851_v40, %s1912_s4 }
0x158c   :  { %1207 = vrot.lane.b32.xlu1 %v1853_v53, %s1912_s4 }
0x15fd   :  { %v1237_v42 = vpop.permute.xlu0 %1236 }
0x15fe   :  { %v1239_v44 = vmul.f32 %v1847_v59, %v1237_v42  ;;  %v1208_v45 = vpop.permute.xlu1 %1207 }
0x15ff   :  { %v1210_v46 = vmul.f32 %v1849_v62, %v1208_v45 }
0x1600   :  { %1241 = vrot.lane.b32.xlu1 %v1239_v44, %s1910_s23 }
0x1601   :  { %v1355_v7 = vrot.slane %v1210_v46, 4  ;;  %1245 = vrot.lane.b32.xlu0 %v1210_v46, %s1912_s4 }
0x1603   :  { %v1366_v12 = vsel %vm54_vm0, %v1365_v11, %v1355_v7 }
0x1672   :  { %v1242_v15 = vpop.permute.xlu1 %1241 }
0x1673   :  { %1462 = vst.msk [vmem:[#allocation2] sm:$0x3] %vm1461_vm7, %v1242_v15  ;;  %v1246_v19 = vpop.permute.xlu0 %1245 }
0x1674   :  { %v1248_v25 = vsel %vm171_vm2, %v1242_v15, %v1246_v19 }
0x1675   :  { %1545 = vmatmul.mubr.msk.f32.vlgmr.msra.gmra.mrb[8].mxu1 %vm173_vm3, %v1248_v25 }
0x1748   :  { %v1318_v26 = vpop.f32.mrb[8].mxu1 }
0x1749   :  { %v1319_v29 = vpop.f32.mrb[9].mxu1 }
0x174a   :  { %v1322_v47 = vadd.f32 %v2141_v21, %v1319_v29 }
0x174c   :  { %1854 = vtanh.f32 %v1322_v47  ;;  %v1546_v41 = vmul.f32 -1.442695, %v1322_v47 }
0x174e   :  { %1856 = vpow2.f32 %v1546_v41 }
0x1756   :  { %v1855_v58 = vpop.eup %1854 }
0x1757   :  { %1332 = vrot.lane.b32.xlu1 %v1855_v58, %s1912_s4 }
0x1758   :  { %v1857_v48 = vpop.eup %1856 }
0x1759   :  { %v1326_v49 = vadd.f32 1.0, %v1857_v48 }
0x175b   :  { %1858 = vrcp.f32 %v1326_v49 }
0x1765   :  { %v1859_v50 = vpop.eup %1858 }
0x1766   :  { %v1330_v57 = vmul.f32 %v1859_v50, %v1204_v3 }
0x17c9   :  { %v1333_v55 = vpop.permute.xlu1 %1332 }
0x17ca   :  { %v1335_v56 = vmul.f32 %v1859_v50, %v1333_v55 }
0x17cc   :  { %1337 = vrot.lane.b32.xlu0 %v1335_v56, %s1910_s23 }
0x17d0   :  { %1376 = vrot.lane.b32.xlu0 %v2233_v2, %s1910_s23  ;;  %v1719_v2 = vpack.c.bf16 %v150_v63, %v149_v52 }
0x17d2   :  { %1720 = vmatprep.subr.bf16.mxu0 %v1719_v2 }
0x17d3   :  { %1722 = vmatpush3.bf16.msra.mxu0 %v1719_v2 }
0x17d4   :  { %1724 = vmatprep.subr.bf16.mxu0 %v1723_v4 }
0x17d7   :  { %1726 = vmatpush3.bf16.msra.mxu0 %v1723_v4 }
0x183e   :  { %v1338_v60 = vpop.permute.xlu0 %1337 }
0x183f   :  { %v1340_v21 = vadd.f32 %v1338_v60, %v1330_v57 }
0x1841   :  { %1860 = vtanh.f32 %v1340_v21 }
0x1842   :  { %v1377_v61 = vpop.permute.xlu0 %1376 }
0x1843   :  { %1572 = vmatprep.mubr.msk.f32.mxu0 %vm171_vm2, %v1377_v61 }
0x184b   :  { %v1861_v5 = vpop.eup %1860 }
0x184c   :  { %1343 = vrot.lane.b32.xlu1 %v1861_v5, %s1912_s4 }
0x18be   :  { %v1344_v6 = vpop.permute.xlu1 %1343 }
0x18bf   :  { %v1346_v8 = vmul.f32 %v1859_v50, %v1344_v6 }
0x18c1   :  { %v1358_v9 = vrot.slane %v1346_v8, 2  ;;  %1463 = vrot.lane.b32.xlu0 %v1346_v8, %s1910_s23 }
0x18c3   :  { %v1367_v10 = vsel %vm1363_vm6, %v1366_v12, %v1358_v9 }
0x18c4   :  { %1378 = vrot.lane.b32.xlu1 %v1367_v10, %s1910_s23 }
0x18c5   :  { %1474 = vrot.lane.b32.xlu0 %v1340_v21, %s1913_s13 }
0x18c8   :  { %1469 = vrot.lane.b32.xlu1 %v2286_v38, %s1913_s13 }
0x1933   :  { %v1464_v13 = vpop.permute.xlu0 %1463 }
0x1934   :  { %1467 = vst.msk [vmem:[#allocation2 + $0x2] sm:$0x3] %vm1461_vm7, %v1464_v13 }
0x1936   :  { %v1379_v14 = vpop.permute.xlu1 %1378 }
0x1937   :  { %v1475_v16 = vpop.permute.xlu0 %1474  ;;  %1573 = vmatmul.mubr.msk.f32.vlgmr.msra.gmra.mrb[10].mxu0 %vm171_vm2, %v1379_v14 }
0x1938   :  { %1478 = vst.msk [vmem:[#allocation4 + $0x2] sm:$0x3] %vm1461_vm7, %v1475_v16 }
0x193a   :  { %v1470_v17 = vpop.permute.xlu1 %1469 }
0x193b   :  { %1472 = vst.msk [vmem:[#allocation4] sm:$0x3] %vm1461_vm7, %v1470_v17 }
0x193c   :  { %1873 = shalt.err (!%p1870_p4)
}
0x193d   :  { %s1874_s20 = scalar_lea.hbm %s2375_s10, 64 }
0x193e   :  { %p1875_p5 = scmp.ne.s32.totalorder %s2375_s10, %s1874_s20  ;;  %p1878_p6 = scmp.lt.u32.totalorder %s1874_s20, %s2375_s10 }
0x1940   :  { %p1880_p7 = pnand %p1878_p6, %p1875_p5 }
0x1942   :  { %1883 = shalt.err (!%p1880_p7)
}
0x1943   :  { %s1916_s4 = smov 2   ;;  %s1884_s3 = scalar_lea.vmem %s1499_s16, 64 }
0x1944   :  { %1492 = dma.vmem_to_hbm [thread:$0]  %s1487_s14, 64, %s2375_s10, [#allocation3], %s1910_s23, %s1910_s23, %s1916_s4  }
0x1945   :  { %p1885_p8 = scmp.ne.s32.totalorder %s1499_s16, %s1884_s3  ;;  %p1889_p9 = scmp.lt.s32.totalorder %s1499_s16, %s1499_s16 }
0x1946   :  { %p1890_p10 = scmp.lt.s32.totalorder %s1884_s3, %s1884_s3 }
0x1948   :  { %p1891_p11 = por %p1890_p10, %p1889_p9 }
0x194a   :  { %p1892_p12 = pnand %p1891_p11, %p1885_p8 }
0x194c   :  { %1895 = shalt.err (!%p1892_p12)
}
0x194d   :  { %s1896_s6 = scalar_lea.hbm %s2376_s11, 64 }
0x194e   :  { %p1897_p13 = scmp.ne.s32.totalorder %s2376_s11, %s1896_s6  ;;  %p1900_p0 = scmp.lt.u32.totalorder %s1896_s6, %s2376_s11 }
0x1950   :  { %p1902_p1 = pnand %p1900_p0, %p1897_p13 }
0x1952   :  { %1905 = shalt.err (!%p1902_p1)
}
0x1953   :  { %1504 = dma.vmem_to_hbm [thread:$0]  %s1499_s16, 64, %s2376_s11, [#allocation5], %s1910_s23, %s1910_s23, %s1916_s4  }
0x1954   :  { %v1547_v18 = vld [vmem:[%s2373_s8] ss:$0 sm:$0xff] }
0x1a0a   :  { %v1574_v51 = vpop.f32.mrb[10].mxu0 }
0x1a0b   :  { %v1456_v20 = vadd.f32 %v1574_v51, %v1547_v18  ;;  %v1450_v22 = vpop.f32.mrb[11].mxu0 }
0x1a0c   :  { %v1451_v23 = vadd.f32 %v1547_v18, %v1450_v22 }
0x1a0d   :  { %1460 = vst.msk [vmem:[%s2374_s9 + $0x8] sm:$0xff] %vm47_vm1, %v1456_v20 }
0x1a0e   :  { %1459 = vst.msk [vmem:[%s2374_s9] sm:$0xff] %vm47_vm1, %v1451_v23 }
0x1a0f   :  { %1906 = dma.done.wait [#allocation3], 64  }
0x1a10   :  { %1907 = vsyncadd [#allocation3], 4294967232 }
0x1a11   :  { %1908 = dma.done.wait [#allocation5], 64  }
0x1a12   :  { %1909 = vsyncadd [#allocation5], 4294967232 }
0x1a13   :  { %1513 = vsyncpa [#allocation3], 1 }
0x1a14   :  { %1514 = vsyncpa [#allocation5], 1 }

</bundles_post_ra>
